<compile_context>
chip_gen: v6e
topology: v6e:2x2x1
jax: 0.10.0
libtpu: 0.0.40
codegen_flags: <defaults>
</compile_context>

<pallas_src>
import functools
import math

import jax
import jax.numpy as jnp
from jax import lax
from jax.experimental import pallas as pl
from jax.experimental.pallas import tpu as pltpu


def _layer_norm(x, gamma, beta, eps=1e-5):
    mu = jnp.mean(x, axis=-1, keepdims=True)
    var = jnp.mean((x - mu) ** 2, axis=-1, keepdims=True)
    return (x - mu) * lax.rsqrt(var + eps) * gamma + beta


def _transformer_kernel(n_heads,
                        x_ref, pos_ref,
                        wqkv_ref, bqkv_ref, wo_ref, lnb_ref,
                        w1_ref, b1_ref, w2_ref,
                        wout_ref, bout_ref,
                        vals_ref, idx_ref,
                        h_ref):
    """grid = (batch_blocks, depth); one transformer layer per depth step."""
    bb, t, e = x_ref.shape
    m = bb * t
    hd = e // n_heads
    f32, bf16 = jnp.float32, jnp.bfloat16

    d = pl.program_id(1)
    n_layers = pl.num_programs(1)

    # ---- layer 0: initialize the residual stream (x + positional encodings) ----
    @pl.when(d == 0)
    def _init():
        xb = x_ref[...].astype(f32) + pos_ref[...][None, :, :]
        h_ref[...] = xb.reshape(m, e)

    h = h_ref[...]                       # (m, e) f32 residual stream
    hb = h.astype(bf16)

    # ---- per-layer parameters (all layers VMEM-resident, indexed by d) ----
    lnb = lnb_ref[d]                     # (8, e): [bo, b2, g1, bt1, g2, bt2, 0, 0]
    bo, b2 = lnb[0:1], lnb[1:2]
    g1, bt1 = lnb[2:3], lnb[3:4]
    g2, bt2 = lnb[4:5], lnb[5:6]
    wo_d = wo_ref[d]                     # (e, e) bf16

    # ---- fused QKV projection (scale already folded into the Q weights) ----
    qkv = jnp.dot(hb, wqkv_ref[d], preferred_element_type=f32) + bqkv_ref[d]
    qkv3 = qkv.astype(bf16).reshape(bb, t, 3 * e)     # single bf16 cast site
    q3 = qkv3[:, :, 0:e]
    k3 = qkv3[:, :, e:2 * e]
    v3 = qkv3[:, :, 2 * e:3 * e]

    # ---- attention ----
    # Per-head context is folded directly into the output projection and
    # accumulated into a full-lane (m, e) f32 value: no narrow masked stores.
    # TODO(synk): a single (bb*n_heads)-batch dot_general pair would need an
    # in-kernel (bb,t,nh,hd)->(bb,nh,t,hd) sublane transpose; keeping the static
    # per-head loop for robust Mosaic lowering at these tiny head dims.
    attn = jnp.zeros((m, e), f32)
    for hh in range(n_heads):
        lo = hh * hd
        qh = q3[:, :, lo:lo + hd]                     # (bb, t, hd)
        kh = k3[:, :, lo:lo + hd]
        vh = v3[:, :, lo:lo + hd]
        s = jnp.einsum('bqd,bkd->bqk', qh, kh,
                       preferred_element_type=f32)    # (bb, t, t) f32
        s = s - jnp.max(s, axis=-1, keepdims=True)
        p = jnp.exp(s)
        p = p * pl.reciprocal(jnp.sum(p, axis=-1, keepdims=True), approx=True)
        ctx_h = jnp.einsum('bqk,bkd->bqd', p.astype(bf16), vh,
                           preferred_element_type=f32)            # (bb, t, hd)
        attn = attn + jnp.dot(ctx_h.reshape(m, hd).astype(bf16),
                              wo_d[lo:lo + hd, :],
                              preferred_element_type=f32)         # (m, e)
    h = _layer_norm(h + attn + bo, g1, bt1)

    # ---- feed-forward ----
    ff = jnp.dot(h.astype(bf16), w1_ref[d], preferred_element_type=f32) + b1_ref[d]
    ff = jnp.maximum(ff, 0.0)
    ff = jnp.dot(ff.astype(bf16), w2_ref[d], preferred_element_type=f32) + b2
    h = _layer_norm(h + ff, g2, bt2)
    h_ref[...] = h

    # ---- final layer: output projection + max over the sequence axis ----
    @pl.when(d == n_layers - 1)
    def _final():
        logits = jnp.dot(h.astype(bf16), wout_ref[...],
                         preferred_element_type=f32) + bout_ref[...]   # (m, outp)
        outp = logits.shape[-1]
        l3 = logits.reshape(bb, t, outp)
        vals = jnp.max(l3, axis=1)                                     # (bb, outp)
        rows = lax.broadcasted_iota(jnp.int32, l3.shape, 1)
        idx = jnp.min(jnp.where(l3 == vals[:, None, :], rows, t), axis=1)
        vals_ref[...] = vals[None]
        idx_ref[...] = idx[None].astype(jnp.int32)


def transformer_forward(x, pos, params, n_heads=8, target_rows=256):
    b, t, e = x.shape
    depth = params["wq"].shape[0]
    ff_e = params["w1"].shape[2]
    outdims = params["wout"].shape[1]
    outp = ((outdims + 127) // 128) * 128          # lane-dense padded output width
    hd = e // n_heads
    scale = 1.0 / math.sqrt(hd)

    # Fold batch rows into the matmul M dimension (target ~256 rows per block),
    # but keep nb >= 2 when possible so both v7x TensorCores get work on the
    # "parallel" grid axis.
    bb = max(1, min(b, pl.cdiv(target_rows, t)))
    if b >= 2:
        bb = min(bb, b // 2)
    bb = max(1, bb)
    while b % bb:
        bb -= 1
    nb = b // bb
    m = bb * t

    f32, bf16 = jnp.float32, jnp.bfloat16
    x_bf = x.astype(bf16)

    # Fused QKV weights (1/sqrt(hd) folded into the Q slice); packed LN/bias rows.
    wqkv = jnp.concatenate(
        [params["wq"] * scale, params["wk"], params["wv"]], axis=-1).astype(bf16)
    bqkv = jnp.concatenate(
        [params["bq"] * scale, params["bk"], params["bv"]], axis=-1).astype(f32)
    lnb = jnp.concatenate(
        [params["bo"], params["b2"], params["g1"], params["bt1"],
         params["g2"], params["bt2"], jnp.zeros((depth, 2, e), f32)],
        axis=1).astype(f32)                                   # (depth, 8, e)
    wo = params["wo"].astype(bf16)
    w1 = params["w1"].astype(bf16)
    b1 = params["b1"].astype(f32)
    w2 = params["w2"].astype(bf16)
    wout_p = jnp.zeros((e, outp), bf16).at[:, :outdims].set(params["wout"].astype(bf16))
    bout_p = jnp.zeros((1, outp), f32).at[:, :outdims].set(params["bout"])

    def resident(shape):
        # Full-array block with a grid-invariant index map: DMA'd once, then
        # kept VMEM-resident for the whole grid (weights are small here).
        n = len(shape)
        return pl.BlockSpec(tuple(shape), lambda i, d, _n=n: (0,) * _n)

    in_specs = [
        pl.BlockSpec((bb, t, e), lambda i, d: (i, 0, 0)),  # x batch block
        resident((t, e)),                                  # positional encodings
        resident((depth, e, 3 * e)),                       # fused QKV weight
        resident((depth, 1, 3 * e)),                       # fused QKV bias
        resident((depth, e, e)),                           # attention out proj
        resident((depth, 8, e)),                           # packed bo,b2,g1,bt1,g2,bt2
        resident((depth, e, ff_e)),                        # ff w1
        resident((depth, 1, ff_e)),                        # ff b1
        resident((depth, ff_e, e)),                        # ff w2
        resident((e, outp)),                               # output weight (padded)
        resident((1, outp)),                               # output bias (padded)
    ]
    out_specs = [
        pl.BlockSpec((1, bb, outp), lambda i, d: (i, 0, 0)),
        pl.BlockSpec((1, bb, outp), lambda i, d: (i, 0, 0)),
    ]
    out_shape = [
        jax.ShapeDtypeStruct((nb, bb, outp), f32),
        jax.ShapeDtypeStruct((nb, bb, outp), jnp.int32),
    ]
    scratch_shapes = [
        pltpu.VMEM((m, e), f32),          # persistent residual stream across depth
    ]

    # Advisory cost estimate (weights counted ONCE: they are VMEM-resident).
    flops = (depth * (2 * b * t * (4 * e * e + 2 * e * ff_e) + 4 * b * t * t * e)
             + 2 * b * t * e * outp)
    transcendentals = depth * b * n_heads * t * t + 4 * depth * b * t
    weight_bytes = (depth * (4 * e * e + 2 * e * ff_e) * 2
                    + depth * (3 * e + ff_e + 8 * e) * 4
                    + e * outp * 2 + outp * 4)
    bytes_accessed = (b * t * e * 2 + t * e * 4 + weight_bytes
                      + nb * bb * outp * 8)
    cost = pl.CostEstimate(flops=int(flops),
                           transcendentals=int(transcendentals),
                           bytes_accessed=int(bytes_accessed))

    kernel = functools.partial(_transformer_kernel, n_heads)
    vals, idx = pl.pallas_call(
        kernel,
        grid=(nb, depth),
        in_specs=in_specs,
        out_specs=out_specs,
        out_shape=out_shape,
        scratch_shapes=scratch_shapes,
        compiler_params=pltpu.CompilerParams(
            dimension_semantics=("parallel", "arbitrary"),
            vmem_limit_bytes=32 * 1024 * 1024),
        cost_estimate=cost,
    )(x_bf, pos.astype(f32),
      wqkv, bqkv, wo, lnb, w1, b1, w2, wout_p, bout_p)

    vals = vals.reshape(b, outp)[:, :outdims]
    idx = idx.reshape(b, outp)[:, :outdims]
    return vals, idx


# ---------------------------------------------------------------------------
# glue: parameter init, positional encodings, pure-JAX reference
# ---------------------------------------------------------------------------

def sinusoidal_pe(max_len, e):
    posn = jnp.arange(max_len, dtype=jnp.float32)[:, None]
    i = jnp.arange(0, e, 2, dtype=jnp.float32)[None, :]
    ang = posn / jnp.power(10000.0, i / e)
    pe = jnp.zeros((max_len, e), jnp.float32)
    pe = pe.at[:, 0::2].set(jnp.sin(ang))
    pe = pe.at[:, 1::2].set(jnp.cos(ang))
    return pe


def init_params(key, e, outdims, depth, ff=4):
    ks = iter(jax.random.split(key, 16))

    def lin(k, fan_in, shape):
        bound = 1.0 / math.sqrt(fan_in)
        return jax.random.uniform(k, shape, jnp.float32, -bound, bound)

    p = {}
    p["wq"] = lin(next(ks), e, (depth, e, e)); p["bq"] = lin(next(ks), e, (depth, 1, e))
    p["wk"] = lin(next(ks), e, (depth, e, e)); p["bk"] = lin(next(ks), e, (depth, 1, e))
    p["wv"] = lin(next(ks), e, (depth, e, e)); p["bv"] = lin(next(ks), e, (depth, 1, e))
    p["wo"] = lin(next(ks), e, (depth, e, e)); p["bo"] = lin(next(ks), e, (depth, 1, e))
    p["g1"] = jnp.ones((depth, 1, e), jnp.float32)
    p["bt1"] = jnp.zeros((depth, 1, e), jnp.float32)
    p["w1"] = lin(next(ks), e, (depth, e, ff * e)); p["b1"] = lin(next(ks), e, (depth, 1, ff * e))
    p["w2"] = lin(next(ks), ff * e, (depth, ff * e, e)); p["b2"] = lin(next(ks), ff * e, (depth, 1, e))
    p["g2"] = jnp.ones((depth, 1, e), jnp.float32)
    p["bt2"] = jnp.zeros((depth, 1, e), jnp.float32)
    p["wout"] = lin(next(ks), e, (e, outdims)); p["bout"] = lin(next(ks), e, (1, outdims))
    return p


def reference_forward(x, pos, params, n_heads=8):
    b, t, e = x.shape
    depth = params["wq"].shape[0]
    hd = e // n_heads
    hp = lax.Precision.HIGHEST
    h = x + pos[None]
    for d in range(depth):
        q = jnp.einsum("bte,ef->btf", h, params["wq"][d], precision=hp) + params["bq"][d]
        k = jnp.einsum("bte,ef->btf", h, params["wk"][d], precision=hp) + params["bk"][d]
        v = jnp.einsum("bte,ef->btf", h, params["wv"][d], precision=hp) + params["bv"][d]
        qh = q.reshape(b, t, n_heads, hd)
        kh = k.reshape(b, t, n_heads, hd)
        vh = v.reshape(b, t, n_heads, hd)
        s = jnp.einsum("bqhd,bkhd->bhqk", qh, kh, precision=hp) / math.sqrt(hd)
        p = jax.nn.softmax(s, axis=-1)
        ctx = jnp.einsum("bhqk,bkhd->bqhd", p, vh, precision=hp).reshape(b, t, e)
        attn = jnp.einsum("bte,ef->btf", ctx, params["wo"][d], precision=hp) + params["bo"][d]
        h = _layer_norm(h + attn, params["g1"][d], params["bt1"][d])
        ff = jnp.einsum("bte,ef->btf", h, params["w1"][d], precision=hp) + params["b1"][d]
        ff = jnp.maximum(ff, 0.0)
        ff = jnp.einsum("btf,fe->bte", ff, params["w2"][d], precision=hp) + params["b2"][d]
        h = _layer_norm(h + ff, params["g2"][d], params["bt2"][d])
    logits = jnp.einsum("bte,eo->bto", h, params["wout"], precision=hp) + params["bout"]
    return jnp.max(logits, axis=1), jnp.argmax(logits, axis=1).astype(jnp.int32)


if __name__ == "__main__":
    B, T, E = 2, 8, 64           # batch, seq, embed (input_dim); n_heads=8 -> head_dim=8
    OUTDIMS, DEPTH, N_HEADS = 16, 2, 8
    MAX_SEQ = 16

    key = jax.random.PRNGKey(0)
    kx, kp = jax.random.split(key)
    x = jax.random.normal(kx, (B, T, E), jnp.float32)
    params = init_params(kp, E, OUTDIMS, DEPTH)
    pos = sinusoidal_pe(MAX_SEQ, E)[:T]

    vals, idx = transformer_forward(x, pos, params, n_heads=N_HEADS)
    jax.block_until_ready((vals, idx))

    ref_vals, ref_idx = reference_forward(x, pos, params, n_heads=N_HEADS)
    assert vals.shape == (B, OUTDIMS) and idx.shape == (B, OUTDIMS)
    assert idx.dtype == jnp.int32
    assert bool(jnp.all((idx >= 0) & (idx < T)))
    # kernel uses bf16 MXU matmuls (f32 accumulation / LN / softmax) and an
    # approx-reciprocal softmax denominator: compare against the f32 reference
    # with a correspondingly loosened tolerance (intentional).
    assert jnp.allclose(vals, ref_vals, rtol=5e-2, atol=5e-2), "values mismatch vs reference"

    print("KERNEL_OK")
</pallas_src>

<mosaic_0001>
module attributes {stable_mosaic.version = 11 : i64} {
  func.func @_transformer_kernel(%arg0: i32, %arg1: i32, %arg2: memref<1x8x64xbf16, #tpu.memory_space<vmem>>, %arg3: memref<8x64xf32, #tpu.memory_space<vmem>>, %arg4: memref<2x64x192xbf16, #tpu.memory_space<vmem>>, %arg5: memref<2x1x192xf32, #tpu.memory_space<vmem>>, %arg6: memref<2x64x64xbf16, #tpu.memory_space<vmem>>, %arg7: memref<2x8x64xf32, #tpu.memory_space<vmem>>, %arg8: memref<2x64x256xbf16, #tpu.memory_space<vmem>>, %arg9: memref<2x1x256xf32, #tpu.memory_space<vmem>>, %arg10: memref<2x256x64xbf16, #tpu.memory_space<vmem>>, %arg11: memref<64x128xbf16, #tpu.memory_space<vmem>>, %arg12: memref<1x128xf32, #tpu.memory_space<vmem>>, %arg13: memref<1x1x128xf32, #tpu.memory_space<vmem>>, %arg14: memref<1x1x128xi32, #tpu.memory_space<vmem>>, %arg15: memref<8x64xf32, #tpu.memory_space<vmem>>) attributes {dimension_semantics = [#tpu.dimension_semantics<parallel>, #tpu.dimension_semantics<arbitrary>], iteration_bounds = array<i64: 2, 2>, scalar_prefetch = 0 : i64, scratch_operands = 1 : i64, tpu.core_type = #tpu.core_type<tc>, window_params = [{transform_indices = @transform_0, window_bounds = array<i64: 1, 8, 64>}, {pipeline_mode = #tpu.pipeline_mode<synchronous>, transform_indices = @transform_1, window_bounds = array<i64: 8, 64>}, {pipeline_mode = #tpu.pipeline_mode<synchronous>, transform_indices = @transform_2, window_bounds = array<i64: 2, 64, 192>}, {pipeline_mode = #tpu.pipeline_mode<synchronous>, transform_indices = @transform_3, window_bounds = array<i64: 2, 1, 192>}, {pipeline_mode = #tpu.pipeline_mode<synchronous>, transform_indices = @transform_4, window_bounds = array<i64: 2, 64, 64>}, {pipeline_mode = #tpu.pipeline_mode<synchronous>, transform_indices = @transform_5, window_bounds = array<i64: 2, 8, 64>}, {pipeline_mode = #tpu.pipeline_mode<synchronous>, transform_indices = @transform_6, window_bounds = array<i64: 2, 64, 256>}, {pipeline_mode = #tpu.pipeline_mode<synchronous>, transform_indices = @transform_7, window_bounds = array<i64: 2, 1, 256>}, {pipeline_mode = #tpu.pipeline_mode<synchronous>, transform_indices = @transform_8, window_bounds = array<i64: 2, 256, 64>}, {pipeline_mode = #tpu.pipeline_mode<synchronous>, transform_indices = @transform_9, window_bounds = array<i64: 64, 128>}, {pipeline_mode = #tpu.pipeline_mode<synchronous>, transform_indices = @transform_10, window_bounds = array<i64: 1, 128>}, {transform_indices = @transform_11, window_bounds = array<i64: 1, 1, 128>}, {transform_indices = @transform_12, window_bounds = array<i64: 1, 1, 128>}]} {
    %c0_i32 = arith.constant 0 : i32
    %0 = arith.cmpi eq, %arg1, %c0_i32 : i32
    %1 = arith.extui %0 : i1 to i32
    %c0_i32_0 = arith.constant 0 : i32
    %2 = arith.cmpi ne, %1, %c0_i32_0 : i32
    scf.if %2 {
      %c0_73 = arith.constant 0 : index
      %c0_74 = arith.constant 0 : index
      %c0_75 = arith.constant 0 : index
      %271 = vector.load %arg2[%c0_73, %c0_74, %c0_75] : memref<1x8x64xbf16, #tpu.memory_space<vmem>>, vector<1x8x64xbf16>
      %272 = arith.extf %271 : vector<1x8x64xbf16> to vector<1x8x64xf32>
      %c0_76 = arith.constant 0 : index
      %c0_77 = arith.constant 0 : index
      %273 = vector.load %arg3[%c0_76, %c0_77] : memref<8x64xf32, #tpu.memory_space<vmem>>, vector<8x64xf32>
      %274 = vector.shape_cast %273 : vector<8x64xf32> to vector<1x8x64xf32>
      %275 = arith.addf %272, %274 : vector<1x8x64xf32>
      %276 = vector.shape_cast %275 : vector<1x8x64xf32> to vector<8x64xf32>
      %c0_78 = arith.constant 0 : index
      %c0_79 = arith.constant 0 : index
      %277 = vector.load %arg15[%c0_78, %c0_79] : memref<8x64xf32, #tpu.memory_space<vmem>>, vector<8x64xf32>
      tpu.vector_store %arg15[%c0_78, %c0_79], %276 {strides = array<i32>} : memref<8x64xf32, #tpu.memory_space<vmem>>, vector<8x64xf32>,
    } else {
    }
    %c0 = arith.constant 0 : index
    %c0_1 = arith.constant 0 : index
    %3 = vector.load %arg15[%c0, %c0_1] : memref<8x64xf32, #tpu.memory_space<vmem>>, vector<8x64xf32>
    %4 = arith.truncf %3 : vector<8x64xf32> to vector<8x64xbf16>
    %5 = arith.index_cast %arg1 : i32 to index
    %c0_2 = arith.constant 0 : index
    %c0_3 = arith.constant 0 : index
    %6 = vector.load %arg7[%5, %c0_2, %c0_3] : memref<2x8x64xf32, #tpu.memory_space<vmem>>, vector<1x8x64xf32>
    %7 = vector.shape_cast %6 : vector<1x8x64xf32> to vector<8x64xf32>
    %8 = vector.extract_strided_slice %7 {offsets = [0, 0], sizes = [1, 64], strides = [1, 1]} : vector<8x64xf32> to vector<1x64xf32>
    %9 = vector.extract_strided_slice %7 {offsets = [1, 0], sizes = [1, 64], strides = [1, 1]} : vector<8x64xf32> to vector<1x64xf32>
    %10 = vector.extract_strided_slice %7 {offsets = [2, 0], sizes = [1, 64], strides = [1, 1]} : vector<8x64xf32> to vector<1x64xf32>
    %11 = vector.extract_strided_slice %7 {offsets = [3, 0], sizes = [1, 64], strides = [1, 1]} : vector<8x64xf32> to vector<1x64xf32>
    %12 = vector.extract_strided_slice %7 {offsets = [4, 0], sizes = [1, 64], strides = [1, 1]} : vector<8x64xf32> to vector<1x64xf32>
    %13 = vector.extract_strided_slice %7 {offsets = [5, 0], sizes = [1, 64], strides = [1, 1]} : vector<8x64xf32> to vector<1x64xf32>
    %14 = arith.index_cast %arg1 : i32 to index
    %c0_4 = arith.constant 0 : index
    %c0_5 = arith.constant 0 : index
    %15 = vector.load %arg6[%14, %c0_4, %c0_5] : memref<2x64x64xbf16, #tpu.memory_space<vmem>>, vector<1x64x64xbf16>
    %16 = vector.shape_cast %15 : vector<1x64x64xbf16> to vector<64x64xbf16>
    %17 = arith.index_cast %arg1 : i32 to index
    %c0_6 = arith.constant 0 : index
    %c0_7 = arith.constant 0 : index
    %18 = vector.load %arg4[%17, %c0_6, %c0_7] : memref<2x64x192xbf16, #tpu.memory_space<vmem>>, vector<1x64x192xbf16>
    %19 = vector.shape_cast %18 : vector<1x64x192xbf16> to vector<64x192xbf16>
    %cst = arith.constant dense<0.000000e+00> : vector<8x192xf32>
    %20 = tpu.matmul %4, %19, %cst {dimension_numbers = #tpu.dot_dimension_numbers<[1], [0], [0], [1], [0, 0, 1, 1], [], []>} : vector<8x64xbf16>, vector<64x192xbf16>, vector<8x192xf32> -> vector<8x192xf32>
    %21 = arith.index_cast %arg1 : i32 to index
    %c0_8 = arith.constant 0 : index
    %c0_9 = arith.constant 0 : index
    %22 = vector.load %arg5[%21, %c0_8, %c0_9] : memref<2x1x192xf32, #tpu.memory_space<vmem>>, vector<1x1x192xf32>
    %23 = vector.shape_cast %22 : vector<1x1x192xf32> to vector<1x192xf32>
    %24 = vector.broadcast %23 : vector<1x192xf32> to vector<8x192xf32>
    %25 = arith.addf %20, %24 : vector<8x192xf32>
    %26 = arith.truncf %25 : vector<8x192xf32> to vector<8x192xbf16>
    %27 = vector.shape_cast %26 : vector<8x192xbf16> to vector<1x8x192xbf16>
    %28 = vector.extract_strided_slice %27 {offsets = [0, 0, 0], sizes = [1, 8, 64], strides = [1, 1, 1]} : vector<1x8x192xbf16> to vector<1x8x64xbf16>
    %29 = vector.extract_strided_slice %27 {offsets = [0, 0, 64], sizes = [1, 8, 64], strides = [1, 1, 1]} : vector<1x8x192xbf16> to vector<1x8x64xbf16>
    %30 = vector.extract_strided_slice %27 {offsets = [0, 0, 128], sizes = [1, 8, 64], strides = [1, 1, 1]} : vector<1x8x192xbf16> to vector<1x8x64xbf16>
    %cst_10 = arith.constant 0.000000e+00 : f32
    %31 = vector.broadcast %cst_10 : f32 to vector<8x64xf32>
    %32 = vector.extract_strided_slice %28 {offsets = [0, 0, 0], sizes = [1, 8, 8], strides = [1, 1, 1]} : vector<1x8x64xbf16> to vector<1x8x8xbf16>
    %33 = vector.extract_strided_slice %29 {offsets = [0, 0, 0], sizes = [1, 8, 8], strides = [1, 1, 1]} : vector<1x8x64xbf16> to vector<1x8x8xbf16>
    %34 = vector.extract_strided_slice %30 {offsets = [0, 0, 0], sizes = [1, 8, 8], strides = [1, 1, 1]} : vector<1x8x64xbf16> to vector<1x8x8xbf16>
    "tpu.trace_start"() <{level = 10 : i32, message = "bqd,bkd->bqk"}> : () -> ()
    %cst_11 = arith.constant dense<0.000000e+00> : vector<1x8x8xf32>
    %35 = tpu.matmul %32, %33, %cst_11 {dimension_numbers = #tpu.dot_dimension_numbers<[2], [2], [1], [1], [0, 0, 0, 1, 1, 1], [0], [0]>} : vector<1x8x8xbf16>, vector<1x8x8xbf16>, vector<1x8x8xf32> -> vector<1x8x8xf32>
    "tpu.trace_stop"() : () -> ()
    %cst_12 = arith.constant dense<0xFF800000> : vector<1x8xf32>
    %36 = vector.multi_reduction <maximumf>, %35, %cst_12 [2] : vector<1x8x8xf32> to vector<1x8xf32>
    %37 = vector.shape_cast %36 : vector<1x8xf32> to vector<1x8x1xf32>
    %38 = vector.broadcast %37 : vector<1x8x1xf32> to vector<1x8x8xf32>
    %39 = arith.subf %35, %38 : vector<1x8x8xf32>
    %40 = math.exp %39 : vector<1x8x8xf32>
    %cst_13 = arith.constant dense<0.000000e+00> : vector<1x8xf32>
    %41 = vector.multi_reduction <add>, %40, %cst_13 [2] : vector<1x8x8xf32> to vector<1x8xf32>
    %42 = vector.shape_cast %41 : vector<1x8xf32> to vector<1x8x1xf32>
    %43 = tpu.reciprocal %42 {approx = true} : vector<1x8x1xf32> -> vector<1x8x1xf32>
    %44 = vector.broadcast %43 : vector<1x8x1xf32> to vector<1x8x8xf32>
    %45 = arith.mulf %40, %44 : vector<1x8x8xf32>
    %46 = arith.truncf %45 : vector<1x8x8xf32> to vector<1x8x8xbf16>
    "tpu.trace_start"() <{level = 10 : i32, message = "bqk,bkd->bqd"}> : () -> ()
    %cst_14 = arith.constant dense<0.000000e+00> : vector<1x8x8xf32>
    %47 = tpu.matmul %46, %34, %cst_14 {dimension_numbers = #tpu.dot_dimension_numbers<[2], [1], [1], [2], [0, 0, 0, 1, 1, 2], [0], [0]>} : vector<1x8x8xbf16>, vector<1x8x8xbf16>, vector<1x8x8xf32> -> vector<1x8x8xf32>
    "tpu.trace_stop"() : () -> ()
    %48 = vector.shape_cast %47 : vector<1x8x8xf32> to vector<8x8xf32>
    %49 = arith.truncf %48 : vector<8x8xf32> to vector<8x8xbf16>
    %50 = vector.extract_strided_slice %16 {offsets = [0, 0], sizes = [8, 64], strides = [1, 1]} : vector<64x64xbf16> to vector<8x64xbf16>
    %cst_15 = arith.constant dense<0.000000e+00> : vector<8x64xf32>
    %51 = tpu.matmul %49, %50, %cst_15 {dimension_numbers = #tpu.dot_dimension_numbers<[1], [0], [0], [1], [0, 0, 1, 1], [], []>} : vector<8x8xbf16>, vector<8x64xbf16>, vector<8x64xf32> -> vector<8x64xf32>
    %52 = arith.addf %31, %51 : vector<8x64xf32>
    %53 = vector.extract_strided_slice %28 {offsets = [0, 0, 8], sizes = [1, 8, 8], strides = [1, 1, 1]} : vector<1x8x64xbf16> to vector<1x8x8xbf16>
    %54 = vector.extract_strided_slice %29 {offsets = [0, 0, 8], sizes = [1, 8, 8], strides = [1, 1, 1]} : vector<1x8x64xbf16> to vector<1x8x8xbf16>
    %55 = vector.extract_strided_slice %30 {offsets = [0, 0, 8], sizes = [1, 8, 8], strides = [1, 1, 1]} : vector<1x8x64xbf16> to vector<1x8x8xbf16>
    "tpu.trace_start"() <{level = 10 : i32, message = "bqd,bkd->bqk"}> : () -> ()
    %cst_16 = arith.constant dense<0.000000e+00> : vector<1x8x8xf32>
    %56 = tpu.matmul %53, %54, %cst_16 {dimension_numbers = #tpu.dot_dimension_numbers<[2], [2], [1], [1], [0, 0, 0, 1, 1, 1], [0], [0]>} : vector<1x8x8xbf16>, vector<1x8x8xbf16>, vector<1x8x8xf32> -> vector<1x8x8xf32>
    "tpu.trace_stop"() : () -> ()
    %cst_17 = arith.constant dense<0xFF800000> : vector<1x8xf32>
    %57 = vector.multi_reduction <maximumf>, %56, %cst_17 [2] : vector<1x8x8xf32> to vector<1x8xf32>
    %58 = vector.shape_cast %57 : vector<1x8xf32> to vector<1x8x1xf32>
    %59 = vector.broadcast %58 : vector<1x8x1xf32> to vector<1x8x8xf32>
    %60 = arith.subf %56, %59 : vector<1x8x8xf32>
    %61 = math.exp %60 : vector<1x8x8xf32>
    %cst_18 = arith.constant dense<0.000000e+00> : vector<1x8xf32>
    %62 = vector.multi_reduction <add>, %61, %cst_18 [2] : vector<1x8x8xf32> to vector<1x8xf32>
    %63 = vector.shape_cast %62 : vector<1x8xf32> to vector<1x8x1xf32>
    %64 = tpu.reciprocal %63 {approx = true} : vector<1x8x1xf32> -> vector<1x8x1xf32>
    %65 = vector.broadcast %64 : vector<1x8x1xf32> to vector<1x8x8xf32>
    %66 = arith.mulf %61, %65 : vector<1x8x8xf32>
    %67 = arith.truncf %66 : vector<1x8x8xf32> to vector<1x8x8xbf16>
    "tpu.trace_start"() <{level = 10 : i32, message = "bqk,bkd->bqd"}> : () -> ()
    %cst_19 = arith.constant dense<0.000000e+00> : vector<1x8x8xf32>
    %68 = tpu.matmul %67, %55, %cst_19 {dimension_numbers = #tpu.dot_dimension_numbers<[2], [1], [1], [2], [0, 0, 0, 1, 1, 2], [0], [0]>} : vector<1x8x8xbf16>, vector<1x8x8xbf16>, vector<1x8x8xf32> -> vector<1x8x8xf32>
    "tpu.trace_stop"() : () -> ()
    %69 = vector.shape_cast %68 : vector<1x8x8xf32> to vector<8x8xf32>
    %70 = arith.truncf %69 : vector<8x8xf32> to vector<8x8xbf16>
    %71 = vector.extract_strided_slice %16 {offsets = [8, 0], sizes = [8, 64], strides = [1, 1]} : vector<64x64xbf16> to vector<8x64xbf16>
    %cst_20 = arith.constant dense<0.000000e+00> : vector<8x64xf32>
    %72 = tpu.matmul %70, %71, %cst_20 {dimension_numbers = #tpu.dot_dimension_numbers<[1], [0], [0], [1], [0, 0, 1, 1], [], []>} : vector<8x8xbf16>, vector<8x64xbf16>, vector<8x64xf32> -> vector<8x64xf32>
    %73 = arith.addf %52, %72 : vector<8x64xf32>
    %74 = vector.extract_strided_slice %28 {offsets = [0, 0, 16], sizes = [1, 8, 8], strides = [1, 1, 1]} : vector<1x8x64xbf16> to vector<1x8x8xbf16>
    %75 = vector.extract_strided_slice %29 {offsets = [0, 0, 16], sizes = [1, 8, 8], strides = [1, 1, 1]} : vector<1x8x64xbf16> to vector<1x8x8xbf16>
    %76 = vector.extract_strided_slice %30 {offsets = [0, 0, 16], sizes = [1, 8, 8], strides = [1, 1, 1]} : vector<1x8x64xbf16> to vector<1x8x8xbf16>
    "tpu.trace_start"() <{level = 10 : i32, message = "bqd,bkd->bqk"}> : () -> ()
    %cst_21 = arith.constant dense<0.000000e+00> : vector<1x8x8xf32>
    %77 = tpu.matmul %74, %75, %cst_21 {dimension_numbers = #tpu.dot_dimension_numbers<[2], [2], [1], [1], [0, 0, 0, 1, 1, 1], [0], [0]>} : vector<1x8x8xbf16>, vector<1x8x8xbf16>, vector<1x8x8xf32> -> vector<1x8x8xf32>
    "tpu.trace_stop"() : () -> ()
    %cst_22 = arith.constant dense<0xFF800000> : vector<1x8xf32>
    %78 = vector.multi_reduction <maximumf>, %77, %cst_22 [2] : vector<1x8x8xf32> to vector<1x8xf32>
    %79 = vector.shape_cast %78 : vector<1x8xf32> to vector<1x8x1xf32>
    %80 = vector.broadcast %79 : vector<1x8x1xf32> to vector<1x8x8xf32>
    %81 = arith.subf %77, %80 : vector<1x8x8xf32>
    %82 = math.exp %81 : vector<1x8x8xf32>
    %cst_23 = arith.constant dense<0.000000e+00> : vector<1x8xf32>
    %83 = vector.multi_reduction <add>, %82, %cst_23 [2] : vector<1x8x8xf32> to vector<1x8xf32>
    %84 = vector.shape_cast %83 : vector<1x8xf32> to vector<1x8x1xf32>
    %85 = tpu.reciprocal %84 {approx = true} : vector<1x8x1xf32> -> vector<1x8x1xf32>
    %86 = vector.broadcast %85 : vector<1x8x1xf32> to vector<1x8x8xf32>
    %87 = arith.mulf %82, %86 : vector<1x8x8xf32>
    %88 = arith.truncf %87 : vector<1x8x8xf32> to vector<1x8x8xbf16>
    "tpu.trace_start"() <{level = 10 : i32, message = "bqk,bkd->bqd"}> : () -> ()
    %cst_24 = arith.constant dense<0.000000e+00> : vector<1x8x8xf32>
    %89 = tpu.matmul %88, %76, %cst_24 {dimension_numbers = #tpu.dot_dimension_numbers<[2], [1], [1], [2], [0, 0, 0, 1, 1, 2], [0], [0]>} : vector<1x8x8xbf16>, vector<1x8x8xbf16>, vector<1x8x8xf32> -> vector<1x8x8xf32>
    "tpu.trace_stop"() : () -> ()
    %90 = vector.shape_cast %89 : vector<1x8x8xf32> to vector<8x8xf32>
    %91 = arith.truncf %90 : vector<8x8xf32> to vector<8x8xbf16>
    %92 = vector.extract_strided_slice %16 {offsets = [16, 0], sizes = [8, 64], strides = [1, 1]} : vector<64x64xbf16> to vector<8x64xbf16>
    %cst_25 = arith.constant dense<0.000000e+00> : vector<8x64xf32>
    %93 = tpu.matmul %91, %92, %cst_25 {dimension_numbers = #tpu.dot_dimension_numbers<[1], [0], [0], [1], [0, 0, 1, 1], [], []>} : vector<8x8xbf16>, vector<8x64xbf16>, vector<8x64xf32> -> vector<8x64xf32>
    %94 = arith.addf %73, %93 : vector<8x64xf32>
    %95 = vector.extract_strided_slice %28 {offsets = [0, 0, 24], sizes = [1, 8, 8], strides = [1, 1, 1]} : vector<1x8x64xbf16> to vector<1x8x8xbf16>
    %96 = vector.extract_strided_slice %29 {offsets = [0, 0, 24], sizes = [1, 8, 8], strides = [1, 1, 1]} : vector<1x8x64xbf16> to vector<1x8x8xbf16>
    %97 = vector.extract_strided_slice %30 {offsets = [0, 0, 24], sizes = [1, 8, 8], strides = [1, 1, 1]} : vector<1x8x64xbf16> to vector<1x8x8xbf16>
    "tpu.trace_start"() <{level = 10 : i32, message = "bqd,bkd->bqk"}> : () -> ()
    %cst_26 = arith.constant dense<0.000000e+00> : vector<1x8x8xf32>
    %98 = tpu.matmul %95, %96, %cst_26 {dimension_numbers = #tpu.dot_dimension_numbers<[2], [2], [1], [1], [0, 0, 0, 1, 1, 1], [0], [0]>} : vector<1x8x8xbf16>, vector<1x8x8xbf16>, vector<1x8x8xf32> -> vector<1x8x8xf32>
    "tpu.trace_stop"() : () -> ()
    %cst_27 = arith.constant dense<0xFF800000> : vector<1x8xf32>
    %99 = vector.multi_reduction <maximumf>, %98, %cst_27 [2] : vector<1x8x8xf32> to vector<1x8xf32>
    %100 = vector.shape_cast %99 : vector<1x8xf32> to vector<1x8x1xf32>
    %101 = vector.broadcast %100 : vector<1x8x1xf32> to vector<1x8x8xf32>
    %102 = arith.subf %98, %101 : vector<1x8x8xf32>
    %103 = math.exp %102 : vector<1x8x8xf32>
    %cst_28 = arith.constant dense<0.000000e+00> : vector<1x8xf32>
    %104 = vector.multi_reduction <add>, %103, %cst_28 [2] : vector<1x8x8xf32> to vector<1x8xf32>
    %105 = vector.shape_cast %104 : vector<1x8xf32> to vector<1x8x1xf32>
    %106 = tpu.reciprocal %105 {approx = true} : vector<1x8x1xf32> -> vector<1x8x1xf32>
    %107 = vector.broadcast %106 : vector<1x8x1xf32> to vector<1x8x8xf32>
    %108 = arith.mulf %103, %107 : vector<1x8x8xf32>
    %109 = arith.truncf %108 : vector<1x8x8xf32> to vector<1x8x8xbf16>
    "tpu.trace_start"() <{level = 10 : i32, message = "bqk,bkd->bqd"}> : () -> ()
    %cst_29 = arith.constant dense<0.000000e+00> : vector<1x8x8xf32>
    %110 = tpu.matmul %109, %97, %cst_29 {dimension_numbers = #tpu.dot_dimension_numbers<[2], [1], [1], [2], [0, 0, 0, 1, 1, 2], [0], [0]>} : vector<1x8x8xbf16>, vector<1x8x8xbf16>, vector<1x8x8xf32> -> vector<1x8x8xf32>
    "tpu.trace_stop"() : () -> ()
    %111 = vector.shape_cast %110 : vector<1x8x8xf32> to vector<8x8xf32>
    %112 = arith.truncf %111 : vector<8x8xf32> to vector<8x8xbf16>
    %113 = vector.extract_strided_slice %16 {offsets = [24, 0], sizes = [8, 64], strides = [1, 1]} : vector<64x64xbf16> to vector<8x64xbf16>
    %cst_30 = arith.constant dense<0.000000e+00> : vector<8x64xf32>
    %114 = tpu.matmul %112, %113, %cst_30 {dimension_numbers = #tpu.dot_dimension_numbers<[1], [0], [0], [1], [0, 0, 1, 1], [], []>} : vector<8x8xbf16>, vector<8x64xbf16>, vector<8x64xf32> -> vector<8x64xf32>
    %115 = arith.addf %94, %114 : vector<8x64xf32>
    %116 = vector.extract_strided_slice %28 {offsets = [0, 0, 32], sizes = [1, 8, 8], strides = [1, 1, 1]} : vector<1x8x64xbf16> to vector<1x8x8xbf16>
    %117 = vector.extract_strided_slice %29 {offsets = [0, 0, 32], sizes = [1, 8, 8], strides = [1, 1, 1]} : vector<1x8x64xbf16> to vector<1x8x8xbf16>
    %118 = vector.extract_strided_slice %30 {offsets = [0, 0, 32], sizes = [1, 8, 8], strides = [1, 1, 1]} : vector<1x8x64xbf16> to vector<1x8x8xbf16>
    "tpu.trace_start"() <{level = 10 : i32, message = "bqd,bkd->bqk"}> : () -> ()
    %cst_31 = arith.constant dense<0.000000e+00> : vector<1x8x8xf32>
    %119 = tpu.matmul %116, %117, %cst_31 {dimension_numbers = #tpu.dot_dimension_numbers<[2], [2], [1], [1], [0, 0, 0, 1, 1, 1], [0], [0]>} : vector<1x8x8xbf16>, vector<1x8x8xbf16>, vector<1x8x8xf32> -> vector<1x8x8xf32>
    "tpu.trace_stop"() : () -> ()
    %cst_32 = arith.constant dense<0xFF800000> : vector<1x8xf32>
    %120 = vector.multi_reduction <maximumf>, %119, %cst_32 [2] : vector<1x8x8xf32> to vector<1x8xf32>
    %121 = vector.shape_cast %120 : vector<1x8xf32> to vector<1x8x1xf32>
    %122 = vector.broadcast %121 : vector<1x8x1xf32> to vector<1x8x8xf32>
    %123 = arith.subf %119, %122 : vector<1x8x8xf32>
    %124 = math.exp %123 : vector<1x8x8xf32>
    %cst_33 = arith.constant dense<0.000000e+00> : vector<1x8xf32>
    %125 = vector.multi_reduction <add>, %124, %cst_33 [2] : vector<1x8x8xf32> to vector<1x8xf32>
    %126 = vector.shape_cast %125 : vector<1x8xf32> to vector<1x8x1xf32>
    %127 = tpu.reciprocal %126 {approx = true} : vector<1x8x1xf32> -> vector<1x8x1xf32>
    %128 = vector.broadcast %127 : vector<1x8x1xf32> to vector<1x8x8xf32>
    %129 = arith.mulf %124, %128 : vector<1x8x8xf32>
    %130 = arith.truncf %129 : vector<1x8x8xf32> to vector<1x8x8xbf16>
    "tpu.trace_start"() <{level = 10 : i32, message = "bqk,bkd->bqd"}> : () -> ()
    %cst_34 = arith.constant dense<0.000000e+00> : vector<1x8x8xf32>
    %131 = tpu.matmul %130, %118, %cst_34 {dimension_numbers = #tpu.dot_dimension_numbers<[2], [1], [1], [2], [0, 0, 0, 1, 1, 2], [0], [0]>} : vector<1x8x8xbf16>, vector<1x8x8xbf16>, vector<1x8x8xf32> -> vector<1x8x8xf32>
    "tpu.trace_stop"() : () -> ()
    %132 = vector.shape_cast %131 : vector<1x8x8xf32> to vector<8x8xf32>
    %133 = arith.truncf %132 : vector<8x8xf32> to vector<8x8xbf16>
    %134 = vector.extract_strided_slice %16 {offsets = [32, 0], sizes = [8, 64], strides = [1, 1]} : vector<64x64xbf16> to vector<8x64xbf16>
    %cst_35 = arith.constant dense<0.000000e+00> : vector<8x64xf32>
    %135 = tpu.matmul %133, %134, %cst_35 {dimension_numbers = #tpu.dot_dimension_numbers<[1], [0], [0], [1], [0, 0, 1, 1], [], []>} : vector<8x8xbf16>, vector<8x64xbf16>, vector<8x64xf32> -> vector<8x64xf32>
    %136 = arith.addf %115, %135 : vector<8x64xf32>
    %137 = vector.extract_strided_slice %28 {offsets = [0, 0, 40], sizes = [1, 8, 8], strides = [1, 1, 1]} : vector<1x8x64xbf16> to vector<1x8x8xbf16>
    %138 = vector.extract_strided_slice %29 {offsets = [0, 0, 40], sizes = [1, 8, 8], strides = [1, 1, 1]} : vector<1x8x64xbf16> to vector<1x8x8xbf16>
    %139 = vector.extract_strided_slice %30 {offsets = [0, 0, 40], sizes = [1, 8, 8], strides = [1, 1, 1]} : vector<1x8x64xbf16> to vector<1x8x8xbf16>
    "tpu.trace_start"() <{level = 10 : i32, message = "bqd,bkd->bqk"}> : () -> ()
    %cst_36 = arith.constant dense<0.000000e+00> : vector<1x8x8xf32>
    %140 = tpu.matmul %137, %138, %cst_36 {dimension_numbers = #tpu.dot_dimension_numbers<[2], [2], [1], [1], [0, 0, 0, 1, 1, 1], [0], [0]>} : vector<1x8x8xbf16>, vector<1x8x8xbf16>, vector<1x8x8xf32> -> vector<1x8x8xf32>
    "tpu.trace_stop"() : () -> ()
    %cst_37 = arith.constant dense<0xFF800000> : vector<1x8xf32>
    %141 = vector.multi_reduction <maximumf>, %140, %cst_37 [2] : vector<1x8x8xf32> to vector<1x8xf32>
    %142 = vector.shape_cast %141 : vector<1x8xf32> to vector<1x8x1xf32>
    %143 = vector.broadcast %142 : vector<1x8x1xf32> to vector<1x8x8xf32>
    %144 = arith.subf %140, %143 : vector<1x8x8xf32>
    %145 = math.exp %144 : vector<1x8x8xf32>
    %cst_38 = arith.constant dense<0.000000e+00> : vector<1x8xf32>
    %146 = vector.multi_reduction <add>, %145, %cst_38 [2] : vector<1x8x8xf32> to vector<1x8xf32>
    %147 = vector.shape_cast %146 : vector<1x8xf32> to vector<1x8x1xf32>
    %148 = tpu.reciprocal %147 {approx = true} : vector<1x8x1xf32> -> vector<1x8x1xf32>
    %149 = vector.broadcast %148 : vector<1x8x1xf32> to vector<1x8x8xf32>
    %150 = arith.mulf %145, %149 : vector<1x8x8xf32>
    %151 = arith.truncf %150 : vector<1x8x8xf32> to vector<1x8x8xbf16>
    "tpu.trace_start"() <{level = 10 : i32, message = "bqk,bkd->bqd"}> : () -> ()
    %cst_39 = arith.constant dense<0.000000e+00> : vector<1x8x8xf32>
    %152 = tpu.matmul %151, %139, %cst_39 {dimension_numbers = #tpu.dot_dimension_numbers<[2], [1], [1], [2], [0, 0, 0, 1, 1, 2], [0], [0]>} : vector<1x8x8xbf16>, vector<1x8x8xbf16>, vector<1x8x8xf32> -> vector<1x8x8xf32>
    "tpu.trace_stop"() : () -> ()
    %153 = vector.shape_cast %152 : vector<1x8x8xf32> to vector<8x8xf32>
    %154 = arith.truncf %153 : vector<8x8xf32> to vector<8x8xbf16>
    %155 = vector.extract_strided_slice %16 {offsets = [40, 0], sizes = [8, 64], strides = [1, 1]} : vector<64x64xbf16> to vector<8x64xbf16>
    %cst_40 = arith.constant dense<0.000000e+00> : vector<8x64xf32>
    %156 = tpu.matmul %154, %155, %cst_40 {dimension_numbers = #tpu.dot_dimension_numbers<[1], [0], [0], [1], [0, 0, 1, 1], [], []>} : vector<8x8xbf16>, vector<8x64xbf16>, vector<8x64xf32> -> vector<8x64xf32>
    %157 = arith.addf %136, %156 : vector<8x64xf32>
    %158 = vector.extract_strided_slice %28 {offsets = [0, 0, 48], sizes = [1, 8, 8], strides = [1, 1, 1]} : vector<1x8x64xbf16> to vector<1x8x8xbf16>
    %159 = vector.extract_strided_slice %29 {offsets = [0, 0, 48], sizes = [1, 8, 8], strides = [1, 1, 1]} : vector<1x8x64xbf16> to vector<1x8x8xbf16>
    %160 = vector.extract_strided_slice %30 {offsets = [0, 0, 48], sizes = [1, 8, 8], strides = [1, 1, 1]} : vector<1x8x64xbf16> to vector<1x8x8xbf16>
    "tpu.trace_start"() <{level = 10 : i32, message = "bqd,bkd->bqk"}> : () -> ()
    %cst_41 = arith.constant dense<0.000000e+00> : vector<1x8x8xf32>
    %161 = tpu.matmul %158, %159, %cst_41 {dimension_numbers = #tpu.dot_dimension_numbers<[2], [2], [1], [1], [0, 0, 0, 1, 1, 1], [0], [0]>} : vector<1x8x8xbf16>, vector<1x8x8xbf16>, vector<1x8x8xf32> -> vector<1x8x8xf32>
    "tpu.trace_stop"() : () -> ()
    %cst_42 = arith.constant dense<0xFF800000> : vector<1x8xf32>
    %162 = vector.multi_reduction <maximumf>, %161, %cst_42 [2] : vector<1x8x8xf32> to vector<1x8xf32>
    %163 = vector.shape_cast %162 : vector<1x8xf32> to vector<1x8x1xf32>
    %164 = vector.broadcast %163 : vector<1x8x1xf32> to vector<1x8x8xf32>
    %165 = arith.subf %161, %164 : vector<1x8x8xf32>
    %166 = math.exp %165 : vector<1x8x8xf32>
    %cst_43 = arith.constant dense<0.000000e+00> : vector<1x8xf32>
    %167 = vector.multi_reduction <add>, %166, %cst_43 [2] : vector<1x8x8xf32> to vector<1x8xf32>
    %168 = vector.shape_cast %167 : vector<1x8xf32> to vector<1x8x1xf32>
    %169 = tpu.reciprocal %168 {approx = true} : vector<1x8x1xf32> -> vector<1x8x1xf32>
    %170 = vector.broadcast %169 : vector<1x8x1xf32> to vector<1x8x8xf32>
    %171 = arith.mulf %166, %170 : vector<1x8x8xf32>
    %172 = arith.truncf %171 : vector<1x8x8xf32> to vector<1x8x8xbf16>
    "tpu.trace_start"() <{level = 10 : i32, message = "bqk,bkd->bqd"}> : () -> ()
    %cst_44 = arith.constant dense<0.000000e+00> : vector<1x8x8xf32>
    %173 = tpu.matmul %172, %160, %cst_44 {dimension_numbers = #tpu.dot_dimension_numbers<[2], [1], [1], [2], [0, 0, 0, 1, 1, 2], [0], [0]>} : vector<1x8x8xbf16>, vector<1x8x8xbf16>, vector<1x8x8xf32> -> vector<1x8x8xf32>
    "tpu.trace_stop"() : () -> ()
    %174 = vector.shape_cast %173 : vector<1x8x8xf32> to vector<8x8xf32>
    %175 = arith.truncf %174 : vector<8x8xf32> to vector<8x8xbf16>
    %176 = vector.extract_strided_slice %16 {offsets = [48, 0], sizes = [8, 64], strides = [1, 1]} : vector<64x64xbf16> to vector<8x64xbf16>
    %cst_45 = arith.constant dense<0.000000e+00> : vector<8x64xf32>
    %177 = tpu.matmul %175, %176, %cst_45 {dimension_numbers = #tpu.dot_dimension_numbers<[1], [0], [0], [1], [0, 0, 1, 1], [], []>} : vector<8x8xbf16>, vector<8x64xbf16>, vector<8x64xf32> -> vector<8x64xf32>
    %178 = arith.addf %157, %177 : vector<8x64xf32>
    %179 = vector.extract_strided_slice %28 {offsets = [0, 0, 56], sizes = [1, 8, 8], strides = [1, 1, 1]} : vector<1x8x64xbf16> to vector<1x8x8xbf16>
    %180 = vector.extract_strided_slice %29 {offsets = [0, 0, 56], sizes = [1, 8, 8], strides = [1, 1, 1]} : vector<1x8x64xbf16> to vector<1x8x8xbf16>
    %181 = vector.extract_strided_slice %30 {offsets = [0, 0, 56], sizes = [1, 8, 8], strides = [1, 1, 1]} : vector<1x8x64xbf16> to vector<1x8x8xbf16>
    "tpu.trace_start"() <{level = 10 : i32, message = "bqd,bkd->bqk"}> : () -> ()
    %cst_46 = arith.constant dense<0.000000e+00> : vector<1x8x8xf32>
    %182 = tpu.matmul %179, %180, %cst_46 {dimension_numbers = #tpu.dot_dimension_numbers<[2], [2], [1], [1], [0, 0, 0, 1, 1, 1], [0], [0]>} : vector<1x8x8xbf16>, vector<1x8x8xbf16>, vector<1x8x8xf32> -> vector<1x8x8xf32>
    "tpu.trace_stop"() : () -> ()
    %cst_47 = arith.constant dense<0xFF800000> : vector<1x8xf32>
    %183 = vector.multi_reduction <maximumf>, %182, %cst_47 [2] : vector<1x8x8xf32> to vector<1x8xf32>
    %184 = vector.shape_cast %183 : vector<1x8xf32> to vector<1x8x1xf32>
    %185 = vector.broadcast %184 : vector<1x8x1xf32> to vector<1x8x8xf32>
    %186 = arith.subf %182, %185 : vector<1x8x8xf32>
    %187 = math.exp %186 : vector<1x8x8xf32>
    %cst_48 = arith.constant dense<0.000000e+00> : vector<1x8xf32>
    %188 = vector.multi_reduction <add>, %187, %cst_48 [2] : vector<1x8x8xf32> to vector<1x8xf32>
    %189 = vector.shape_cast %188 : vector<1x8xf32> to vector<1x8x1xf32>
    %190 = tpu.reciprocal %189 {approx = true} : vector<1x8x1xf32> -> vector<1x8x1xf32>
    %191 = vector.broadcast %190 : vector<1x8x1xf32> to vector<1x8x8xf32>
    %192 = arith.mulf %187, %191 : vector<1x8x8xf32>
    %193 = arith.truncf %192 : vector<1x8x8xf32> to vector<1x8x8xbf16>
    "tpu.trace_start"() <{level = 10 : i32, message = "bqk,bkd->bqd"}> : () -> ()
    %cst_49 = arith.constant dense<0.000000e+00> : vector<1x8x8xf32>
    %194 = tpu.matmul %193, %181, %cst_49 {dimension_numbers = #tpu.dot_dimension_numbers<[2], [1], [1], [2], [0, 0, 0, 1, 1, 2], [0], [0]>} : vector<1x8x8xbf16>, vector<1x8x8xbf16>, vector<1x8x8xf32> -> vector<1x8x8xf32>
    "tpu.trace_stop"() : () -> ()
    %195 = vector.shape_cast %194 : vector<1x8x8xf32> to vector<8x8xf32>
    %196 = arith.truncf %195 : vector<8x8xf32> to vector<8x8xbf16>
    %197 = vector.extract_strided_slice %16 {offsets = [56, 0], sizes = [8, 64], strides = [1, 1]} : vector<64x64xbf16> to vector<8x64xbf16>
    %cst_50 = arith.constant dense<0.000000e+00> : vector<8x64xf32>
    %198 = tpu.matmul %196, %197, %cst_50 {dimension_numbers = #tpu.dot_dimension_numbers<[1], [0], [0], [1], [0, 0, 1, 1], [], []>} : vector<8x8xbf16>, vector<8x64xbf16>, vector<8x64xf32> -> vector<8x64xf32>
    %199 = arith.addf %178, %198 : vector<8x64xf32>
    %200 = arith.addf %3, %199 : vector<8x64xf32>
    %201 = vector.broadcast %8 : vector<1x64xf32> to vector<8x64xf32>
    %202 = arith.addf %200, %201 : vector<8x64xf32>
    %cst_51 = arith.constant dense<0.000000e+00> : vector<8xf32>
    %203 = vector.multi_reduction <add>, %202, %cst_51 [1] : vector<8x64xf32> to vector<8xf32>
    %204 = vector.shape_cast %203 : vector<8xf32> to vector<8x1xf32>
    %cst_52 = arith.constant 6.400000e+01 : f32
    %205 = vector.broadcast %cst_52 : f32 to vector<8x1xf32>
    %206 = arith.divf %204, %205 : vector<8x1xf32>
    %207 = vector.broadcast %206 : vector<8x1xf32> to vector<8x64xf32>
    %208 = arith.subf %202, %207 : vector<8x64xf32>
    %209 = arith.mulf %208, %208 : vector<8x64xf32>
    %cst_53 = arith.constant dense<0.000000e+00> : vector<8xf32>
    %210 = vector.multi_reduction <add>, %209, %cst_53 [1] : vector<8x64xf32> to vector<8xf32>
    %211 = vector.shape_cast %210 : vector<8xf32> to vector<8x1xf32>
    %cst_54 = arith.constant 6.400000e+01 : f32
    %212 = vector.broadcast %cst_54 : f32 to vector<8x1xf32>
    %213 = arith.divf %211, %212 : vector<8x1xf32>
    %214 = vector.broadcast %206 : vector<8x1xf32> to vector<8x64xf32>
    %215 = arith.subf %202, %214 : vector<8x64xf32>
    %cst_55 = arith.constant 9.99999974E-6 : f32
    %216 = vector.broadcast %cst_55 : f32 to vector<8x1xf32>
    %217 = arith.addf %213, %216 : vector<8x1xf32>
    %218 = math.rsqrt %217 : vector<8x1xf32>
    %219 = vector.broadcast %218 : vector<8x1xf32> to vector<8x64xf32>
    %220 = arith.mulf %215, %219 : vector<8x64xf32>
    %221 = vector.broadcast %10 : vector<1x64xf32> to vector<8x64xf32>
    %222 = arith.mulf %220, %221 : vector<8x64xf32>
    %223 = vector.broadcast %11 : vector<1x64xf32> to vector<8x64xf32>
    %224 = arith.addf %222, %223 : vector<8x64xf32>
    %225 = arith.truncf %224 : vector<8x64xf32> to vector<8x64xbf16>
    %226 = arith.index_cast %arg1 : i32 to index
    %c0_56 = arith.constant 0 : index
    %c0_57 = arith.constant 0 : index
    %227 = vector.load %arg8[%226, %c0_56, %c0_57] : memref<2x64x256xbf16, #tpu.memory_space<vmem>>, vector<1x64x256xbf16>
    %228 = vector.shape_cast %227 : vector<1x64x256xbf16> to vector<64x256xbf16>
    %cst_58 = arith.constant dense<0.000000e+00> : vector<8x256xf32>
    %229 = tpu.matmul %225, %228, %cst_58 {dimension_numbers = #tpu.dot_dimension_numbers<[1], [0], [0], [1], [0, 0, 1, 1], [], []>} : vector<8x64xbf16>, vector<64x256xbf16>, vector<8x256xf32> -> vector<8x256xf32>
    %230 = arith.index_cast %arg1 : i32 to index
    %c0_59 = arith.constant 0 : index
    %c0_60 = arith.constant 0 : index
    %231 = vector.load %arg9[%230, %c0_59, %c0_60] : memref<2x1x256xf32, #tpu.memory_space<vmem>>, vector<1x1x256xf32>
    %232 = vector.shape_cast %231 : vector<1x1x256xf32> to vector<1x256xf32>
    %233 = vector.broadcast %232 : vector<1x256xf32> to vector<8x256xf32>
    %234 = arith.addf %229, %233 : vector<8x256xf32>
    %cst_61 = arith.constant 0.000000e+00 : f32
    %235 = vector.broadcast %cst_61 : f32 to vector<8x256xf32>
    %236 = arith.maximumf %234, %235 : vector<8x256xf32>
    %237 = arith.truncf %236 : vector<8x256xf32> to vector<8x256xbf16>
    %238 = arith.index_cast %arg1 : i32 to index
    %c0_62 = arith.constant 0 : index
    %c0_63 = arith.constant 0 : index
    %239 = vector.load %arg10[%238, %c0_62, %c0_63] : memref<2x256x64xbf16, #tpu.memory_space<vmem>>, vector<1x256x64xbf16>
    %240 = vector.shape_cast %239 : vector<1x256x64xbf16> to vector<256x64xbf16>
    %cst_64 = arith.constant dense<0.000000e+00> : vector<8x64xf32>
    %241 = tpu.matmul %237, %240, %cst_64 {dimension_numbers = #tpu.dot_dimension_numbers<[1], [0], [0], [1], [0, 0, 1, 1], [], []>} : vector<8x256xbf16>, vector<256x64xbf16>, vector<8x64xf32> -> vector<8x64xf32>
    %242 = vector.broadcast %9 : vector<1x64xf32> to vector<8x64xf32>
    %243 = arith.addf %241, %242 : vector<8x64xf32>
    %244 = arith.addf %224, %243 : vector<8x64xf32>
    %cst_65 = arith.constant dense<0.000000e+00> : vector<8xf32>
    %245 = vector.multi_reduction <add>, %244, %cst_65 [1] : vector<8x64xf32> to vector<8xf32>
    %246 = vector.shape_cast %245 : vector<8xf32> to vector<8x1xf32>
    %cst_66 = arith.constant 6.400000e+01 : f32
    %247 = vector.broadcast %cst_66 : f32 to vector<8x1xf32>
    %248 = arith.divf %246, %247 : vector<8x1xf32>
    %249 = vector.broadcast %248 : vector<8x1xf32> to vector<8x64xf32>
    %250 = arith.subf %244, %249 : vector<8x64xf32>
    %251 = arith.mulf %250, %250 : vector<8x64xf32>
    %cst_67 = arith.constant dense<0.000000e+00> : vector<8xf32>
    %252 = vector.multi_reduction <add>, %251, %cst_67 [1] : vector<8x64xf32> to vector<8xf32>
    %253 = vector.shape_cast %252 : vector<8xf32> to vector<8x1xf32>
    %cst_68 = arith.constant 6.400000e+01 : f32
    %254 = vector.broadcast %cst_68 : f32 to vector<8x1xf32>
    %255 = arith.divf %253, %254 : vector<8x1xf32>
    %256 = vector.broadcast %248 : vector<8x1xf32> to vector<8x64xf32>
    %257 = arith.subf %244, %256 : vector<8x64xf32>
    %cst_69 = arith.constant 9.99999974E-6 : f32
    %258 = vector.broadcast %cst_69 : f32 to vector<8x1xf32>
    %259 = arith.addf %255, %258 : vector<8x1xf32>
    %260 = math.rsqrt %259 : vector<8x1xf32>
    %261 = vector.broadcast %260 : vector<8x1xf32> to vector<8x64xf32>
    %262 = arith.mulf %257, %261 : vector<8x64xf32>
    %263 = vector.broadcast %12 : vector<1x64xf32> to vector<8x64xf32>
    %264 = arith.mulf %262, %263 : vector<8x64xf32>
    %265 = vector.broadcast %13 : vector<1x64xf32> to vector<8x64xf32>
    %266 = arith.addf %264, %265 : vector<8x64xf32>
    %c0_70 = arith.constant 0 : index
    %c0_71 = arith.constant 0 : index
    %267 = vector.load %arg15[%c0_70, %c0_71] : memref<8x64xf32, #tpu.memory_space<vmem>>, vector<8x64xf32>
    tpu.vector_store %arg15[%c0_70, %c0_71], %266 {strides = array<i32>} : memref<8x64xf32, #tpu.memory_space<vmem>>, vector<8x64xf32>,
    %c1_i32 = arith.constant 1 : i32
    %268 = arith.cmpi eq, %arg1, %c1_i32 : i32
    %269 = arith.extui %268 : i1 to i32
    %c0_i32_72 = arith.constant 0 : i32
    %270 = arith.cmpi ne, %269, %c0_i32_72 : i32
    scf.if %270 {
      %271 = arith.truncf %266 : vector<8x64xf32> to vector<8x64xbf16>
      %c0_73 = arith.constant 0 : index
      %c0_74 = arith.constant 0 : index
      %272 = vector.load %arg11[%c0_73, %c0_74] : memref<64x128xbf16, #tpu.memory_space<vmem>>, vector<64x128xbf16>
      %cst_75 = arith.constant dense<0.000000e+00> : vector<8x128xf32>
      %273 = tpu.matmul %271, %272, %cst_75 {dimension_numbers = #tpu.dot_dimension_numbers<[1], [0], [0], [1], [0, 0, 1, 1], [], []>} : vector<8x64xbf16>, vector<64x128xbf16>, vector<8x128xf32> -> vector<8x128xf32>
      %c0_76 = arith.constant 0 : index
      %c0_77 = arith.constant 0 : index
      %274 = vector.load %arg12[%c0_76, %c0_77] : memref<1x128xf32, #tpu.memory_space<vmem>>, vector<1x128xf32>
      %275 = vector.broadcast %274 : vector<1x128xf32> to vector<8x128xf32>
      %276 = arith.addf %273, %275 : vector<8x128xf32>
      %277 = vector.shape_cast %276 : vector<8x128xf32> to vector<1x8x128xf32>
      %cst_78 = arith.constant dense<0xFF800000> : vector<1x128xf32>
      %278 = vector.multi_reduction <maximumf>, %277, %cst_78 [1] : vector<1x8x128xf32> to vector<1x128xf32>
      %279 = tpu.iota {dimensions = array<i32: 1>} : vector<1x8x128xi32>
      %280 = vector.shape_cast %278 : vector<1x128xf32> to vector<1x1x128xf32>
      %281 = vector.broadcast %280 : vector<1x1x128xf32> to vector<1x8x128xf32>
      %282 = arith.cmpf oeq, %277, %281 : vector<1x8x128xf32>
      %c8_i32 = arith.constant 8 : i32
      %283 = vector.broadcast %c8_i32 : i32 to vector<1x8x128xi32>
      %284 = arith.select %282, %279, %283 : vector<1x8x128xi1>, vector<1x8x128xi32>
      %cst_79 = arith.constant dense<2147483647> : vector<1x128xi32>
      %285 = vector.multi_reduction <minsi>, %284, %cst_79 [1] : vector<1x8x128xi32> to vector<1x128xi32>
      %286 = vector.shape_cast %278 : vector<1x128xf32> to vector<1x1x128xf32>
      %c0_80 = arith.constant 0 : index
      %c0_81 = arith.constant 0 : index
      %c0_82 = arith.constant 0 : index
      %287 = vector.load %arg13[%c0_80, %c0_81, %c0_82] : memref<1x1x128xf32, #tpu.memory_space<vmem>>, vector<1x1x128xf32>
      tpu.vector_store %arg13[%c0_80, %c0_81, %c0_82], %286 {strides = array<i32>} : memref<1x1x128xf32, #tpu.memory_space<vmem>>, vector<1x1x128xf32>,
      %288 = vector.shape_cast %285 : vector<1x128xi32> to vector<1x1x128xi32>
      %c0_83 = arith.constant 0 : index
      %c0_84 = arith.constant 0 : index
      %c0_85 = arith.constant 0 : index
      %289 = vector.load %arg14[%c0_83, %c0_84, %c0_85] : memref<1x1x128xi32, #tpu.memory_space<vmem>>, vector<1x1x128xi32>
      tpu.vector_store %arg14[%c0_83, %c0_84, %c0_85], %288 {strides = array<i32>} : memref<1x1x128xi32, #tpu.memory_space<vmem>>, vector<1x1x128xi32>,
    } else {
    }
    return
  }
  func.func @transform_0(%arg0: i32, %arg1: i32) -> (i32, i32, i32) {
    %c0_i32 = arith.constant 0 : i32
    %c0_i32_0 = arith.constant 0 : i32
    %c0_i32_1 = arith.constant 0 : i32
    return %arg0, %c0_i32, %c0_i32_0 : i32, i32, i32
  }
  func.func @transform_1(%arg0: i32, %arg1: i32) -> (i32, i32) {
    %c0_i32 = arith.constant 0 : i32
    %c0_i32_0 = arith.constant 0 : i32
    %c0_i32_1 = arith.constant 0 : i32
    return %c0_i32, %c0_i32_0 : i32, i32
  }
  func.func @transform_2(%arg0: i32, %arg1: i32) -> (i32, i32, i32) {
    %c0_i32 = arith.constant 0 : i32
    %c0_i32_0 = arith.constant 0 : i32
    %c0_i32_1 = arith.constant 0 : i32
    %c0_i32_2 = arith.constant 0 : i32
    return %c0_i32, %c0_i32_0, %c0_i32_1 : i32, i32, i32
  }
  func.func @transform_3(%arg0: i32, %arg1: i32) -> (i32, i32, i32) {
    %c0_i32 = arith.constant 0 : i32
    %c0_i32_0 = arith.constant 0 : i32
    %c0_i32_1 = arith.constant 0 : i32
    %c0_i32_2 = arith.constant 0 : i32
    return %c0_i32, %c0_i32_0, %c0_i32_1 : i32, i32, i32
  }
  func.func @transform_4(%arg0: i32, %arg1: i32) -> (i32, i32, i32) {
    %c0_i32 = arith.constant 0 : i32
    %c0_i32_0 = arith.constant 0 : i32
    %c0_i32_1 = arith.constant 0 : i32
    %c0_i32_2 = arith.constant 0 : i32
    return %c0_i32, %c0_i32_0, %c0_i32_1 : i32, i32, i32
  }
  func.func @transform_5(%arg0: i32, %arg1: i32) -> (i32, i32, i32) {
    %c0_i32 = arith.constant 0 : i32
    %c0_i32_0 = arith.constant 0 : i32
    %c0_i32_1 = arith.constant 0 : i32
    %c0_i32_2 = arith.constant 0 : i32
    return %c0_i32, %c0_i32_0, %c0_i32_1 : i32, i32, i32
  }
  func.func @transform_6(%arg0: i32, %arg1: i32) -> (i32, i32, i32) {
    %c0_i32 = arith.constant 0 : i32
    %c0_i32_0 = arith.constant 0 : i32
    %c0_i32_1 = arith.constant 0 : i32
    %c0_i32_2 = arith.constant 0 : i32
    return %c0_i32, %c0_i32_0, %c0_i32_1 : i32, i32, i32
  }
  func.func @transform_7(%arg0: i32, %arg1: i32) -> (i32, i32, i32) {
    %c0_i32 = arith.constant 0 : i32
    %c0_i32_0 = arith.constant 0 : i32
    %c0_i32_1 = arith.constant 0 : i32
    %c0_i32_2 = arith.constant 0 : i32
    return %c0_i32, %c0_i32_0, %c0_i32_1 : i32, i32, i32
  }
  func.func @transform_8(%arg0: i32, %arg1: i32) -> (i32, i32, i32) {
    %c0_i32 = arith.constant 0 : i32
    %c0_i32_0 = arith.constant 0 : i32
    %c0_i32_1 = arith.constant 0 : i32
    %c0_i32_2 = arith.constant 0 : i32
    return %c0_i32, %c0_i32_0, %c0_i32_1 : i32, i32, i32
  }
  func.func @transform_9(%arg0: i32, %arg1: i32) -> (i32, i32) {
    %c0_i32 = arith.constant 0 : i32
    %c0_i32_0 = arith.constant 0 : i32
    %c0_i32_1 = arith.constant 0 : i32
    return %c0_i32, %c0_i32_0 : i32, i32
  }
  func.func @transform_10(%arg0: i32, %arg1: i32) -> (i32, i32) {
    %c0_i32 = arith.constant 0 : i32
    %c0_i32_0 = arith.constant 0 : i32
    %c0_i32_1 = arith.constant 0 : i32
    return %c0_i32, %c0_i32_0 : i32, i32
  }
  func.func @transform_11(%arg0: i32, %arg1: i32) -> (i32, i32, i32) {
    %c0_i32 = arith.constant 0 : i32
    %c0_i32_0 = arith.constant 0 : i32
    %c0_i32_1 = arith.constant 0 : i32
    return %arg0, %c0_i32, %c0_i32_0 : i32, i32, i32
  }
  func.func @transform_12(%arg0: i32, %arg1: i32) -> (i32, i32, i32) {
    %c0_i32 = arith.constant 0 : i32
    %c0_i32_0 = arith.constant 0 : i32
    %c0_i32_1 = arith.constant 0 : i32
    return %arg0, %c0_i32, %c0_i32_0 : i32, i32, i32
  }
}

</mosaic_0001>

<bundles_post_ra>
// kernel: tpu_custom_call.1
= control target key start
LH: loop header
LB: loop body
LE: loop exit
PB: predicated region body
PF: predicated region fallthrough
CT: control target
= control target key end

     0   :  { %s3587_s0 = inlined_call_operand.vmem [shape: bf16[2,8,64], index: 0, kind: input, shape index: {}]   ;;  %s3588_s1 = inlined_call_operand.vmem [shape: f32[8,64], index: 1, kind: input, shape index: {}]   ;;  %s3589_s2 = inlined_call_operand.vmem [shape: bf16[2,64,192], index: 2, kind: input, shape index: {}]   ;;  %s3590_s3 = inlined_call_operand.vmem [shape: f32[2,1,192], index: 3, kind: input, shape index: {}]   ;;  %s3591_s4 = inlined_call_operand.vmem [shape: bf16[2,64,64], index: 4, kind: input, shape index: {}]   ;;  %s3592_s5 = inlined_call_operand.vmem [shape: f32[2,8,64], index: 5, kind: input, shape index: {}]   ;;  %s3593_s6 = inlined_call_operand.vmem [shape: bf16[2,64,256], index: 6, kind: input, shape index: {}]   ;;  %s3594_s7 = inlined_call_operand.vmem [shape: f32[2,1,256], index: 7, kind: input, shape index: {}]   ;;  %s3595_s8 = inlined_call_operand.vmem [shape: bf16[2,256,64], index: 8, kind: input, shape index: {}]   ;;  %s3596_s9 = inlined_call_operand.vmem [shape: bf16[64,128], index: 9, kind: input, shape index: {}]   ;;  %s3597_s10 = inlined_call_operand.vmem [shape: f32[1,128], index: 10, kind: input, shape index: {}]   ;;  %s3598_s11 = inlined_call_operand.hbm [shape: f32[2,1,128], index: 11, kind: output, shape index: {0}]   ;;  %s3599_s12 = inlined_call_operand.hbm [shape: s32[2,1,128], index: 12, kind: output, shape index: {1}]  }
   0x1   :  { %3606 = sst [smem:[#allocation15_spill]] %s3587_s0 }
   0x2   :  { %3607 = sst [smem:[#allocation16_spill]] %s3588_s1 }
   0x3   :  { %3608 = sst [smem:[#allocation17_spill]] %s3589_s2 }
   0x4   :  { %18 = vsyncpa [#allocation4], 0 }
   0x5   :  { %20 = vsyncpa [#allocation4 + $0x1], 0 }
   0x6   :  { %21 = vsyncpa [#allocation6], 0 }
   0x7   :  { %23 = vsyncpa [#allocation6 + $0x1], 0  ;;  %s3124_s21 = smov 0   ;;  %s3126_s22 = smov 0  }
   0x8   :  { %s3128_s23 = smov 0   ;;  %s3130_s24 = smov 0  }
   0x9   :  { %s3132_s25 = smov 0   ;;  %s3134_s26 = smov 0  }
   0xa   :  { %s3136_s27 = smov 0   ;;  %s3138_s28 = smov 0  }
   0xb LB: > { %3609 = sst [smem:[#allocation9_spill]] %s3027_s26  ;;  %s2418_s29 = sadd.s32 4294967295, %s3035_s28   ;;  %s3035_s28 = sphi %s3138_s28, %s29_s28   ;;  %s3031_s27 = sphi %s3136_s27, %s3627_s27   ;;  %s3027_s26 = sphi %s3134_s26, %s3626_s26   ;;  %s3023_s25 = sphi %s3132_s25, %s3625_s25   ;;  %s3019_s24 = sphi %s3130_s24, %s3624_s24   ;;  %s3015_s23 = sphi %s3128_s23, %s3630_s23   ;;  %s3011_s22 = sphi %s3126_s22, %s3629_s22   ;;  %s3007_s21 = sphi %s3124_s21, %s3628_s21  }
   0xc   : > { %3610 = sst [smem:[#allocation10_spill]] %s3031_s27  ;;  %s2419_s30 = sadd.s32 4294967294, %s3035_s28  }
   0xd   : > { %s38_s13 = sadd.s32 1, %s3027_s26  ;;  %s41_s14 = sadd.s32 1, %s3031_s27 }
   0xe   : > { %p39_p0 = scmp.ge.s32.totalorder %s38_s13, 2  ;;  %p294_p1 = scmp.ne.s32.totalorder %s3015_s23, %s3011_s22 }
   0xf   : > { %p295_p2 = scmp.eq.s32.totalorder %s2418_s29, 3  ;;  %p300_p4 = scmp.ne.s32.totalorder %s3011_s22, %s3007_s21 }
  0x10   : > { %s3632_s13 = smov (%p39_p0, %s38_s13), 0  ;;  %s3634_s14 = smov (!%p39_p0, %s41_s14), %s3031_s27 }
  0x11   : > { %3611 = sst [smem:[#allocation11_spill]] %s3632_s13  ;;  %p3173_p3 = por %p295_p2, %p294_p1 }
  0x12   : > { %p43_p5 = scmp.ge.s32.totalorder %s3634_s14, 2  ;;  %p301_p6 = scmp.eq.s32.totalorder %s2419_s30, 3 }
  0x13   : > { %p2422_p7 = scmp.ge.s32.totalorder %s3035_s28, 1  ;;  %p382_p8 = scmp.lt.s32.totalorder %s3035_s28, 5 }
  0x14   : > { %s3636_s14 = smov (%p43_p5, %s3634_s14), 0  ;;  %p3183_p9 = por %p301_p6, %p300_p4 }
  0x15   : > { %3613 = sst [smem:[#allocation12_spill]] %s3636_s14  ;;  %p383_p10 = pnand %p2422_p7, %p382_p8 }
  0x16   : > { %s3614_s16 = scalar_select %p3183_p9, 1, 0 }
  0x17   : > { %s281_s17 = ssub.s32 %s3031_s27, %s3636_s14  ;;  %s284_s18 = sadd.s32 1, %s3015_s23 }
  0x18   : > { %3615 = sst [smem:[#allocation13_spill]] %s3614_s16  ;;  %p282_p11 = scmp.eq.s32.totalorder %s281_s17, 0 }
  0x19   : > { %386 = sbr.rel (%p383_p10) target bundleno = 5888 (0x1700), region = 64  ;;  %s3194_s20 = sand.u32 (!%p383_p10), 1, %s3011_s22  }
  0x1a   : > { %s3191_s19 = scalar_select %p282_p11, %s3015_s23, %s284_s18  }
  0x1b   : > { %p426_p12 = scmp.lt.s32.totalorder (!%p383_p10), %s3023_s25, 1  ;;  %s3617_s0 = sld [smem:[#allocation15_spill]] (!%p383_p10) }
  0x1c   : > { %3616 = sst [smem:[#allocation14_spill]] %s3191_s19  ;;  %s419_s14 = scalar_lea.vmem (!%p383_p10), [#allocation3], %s3194_s20 }
  0x1d   : > { %s3604_s27 = scalar_lea.vmem (!%p383_p10), [#allocation5], %s3194_s20  ;;  %p2424_p13 = scmp.ne.s32.totalorder (!%p383_p10), %s3019_s24, 0 }
  0x1e   : > { %s427_s29 = scalar_select %p426_p12, %s3023_s25, 1 }
  0x1f   : > { %434 = sbr.rel (%p2424_p13) target bundleno = 42 (0x2a), region = 68  ;;  %s3618_s1 = sld [smem:[#allocation16_spill]] (!%p2424_p13) }
  0x20   : > { %s2423_s30 = sshll.u32 %s427_s29, 2 }
  0x21   : > { %s429_s16 = scalar_lea.vmem %s3617_s0, %s2423_s30 }
  0x24   : > { %v435_v0 = vld [vmem:[%s429_s16] sm:$0xf]  ;;  %vm439_vm0 = vcmask 523264  }
  0x25   : > { %v437_v1 = vld [vmem:[%s3618_s1] sm:$0xff]  ;;  %v436_v2 = vunpack.c.l.bf16 %v435_v0 }
  0x27   : > { %v438_v3 = vadd.f32 %v437_v1, %v436_v2 }
  0x29   : > { %440 = vst.msk [vmem:[#allocation2] sm:$0xff] %vm439_vm0, %v438_v3 }
  0x2a PF: > { %s2503_s29 = sshll.u32 %s3019_s24, 6  ;;  %s3619_s2 = sld [smem:[#allocation17_spill]]  ;;  %v3037_v4 = vmov 0   ;;  %vm521_vm1 = vcmask 523264   ;;  %v3038_v15 = vmov 0.0   ;;  %v471_v16 = vlaneseq }
  0x2b   : > { %557 = vmatprep.mubr.bf16.mxu0 %v3037_v4  ;;  %s3215_s17 = scalar_lea.vmem %s3593_s6, %s2503_s29  ;;  %2587 = vmatprep.subr.bf16.mxu1 %v3038_v15  ;;  %s2429_s19 = sshll.u32 %s3019_s24, 1  ;;  %vm3039_vm2 = vmmov 0   ;;  %vm633_vm3 = vcmask 1043456   ;;  %vm571_vm4 = vcmask 64512  }
  0x2c   : > { %v3225_v17 = vshrl.u32 %v471_v16, 7  ;;  %s468_s26 = scalar_lea.vmem %s3590_s3, %s2429_s19  ;;  %2589 = vmatprep.mubr.msk.bf16.mxu1 %vm3039_vm2, %v3038_v15  ;;  %s3041_s16 = smov 64  }
  0x2d   : > { %v469_v19 = vld [vmem:[%s468_s26] sm:$0x3]  ;;  %s3042_s30 = smov 56   ;;  %s3043_s18 = smov 48  }
  0x2e   : > { %v3233_v18 = vsub.s32 0, %v3225_v17  ;;  %v3236_v20 = vsub.s32 1, %v3225_v17  ;;  %s2502_s26 = sshll.u32 %s3019_s24, 5  ;;  %p2491_p0 = scmp.ne.s32.totalorder %s3019_s24, 1 }
  0x30   : > { %s458_s13 = scalar_lea.vmem %s3619_s2, %s2503_s29  ;;  %v3217_v13 = vld [vmem:[#allocation2] sm:$0xff]  ;;  %v474_v21 = vrot.slane %v469_v19, %v3233_v18  ;;  %v478_v22 = vrot.slane %v469_v19, %v3236_v20  ;;  %s3044_s29 = smov 112  }
  0x31   : > { %v2833_v5 = vld [vmem:[%s458_s13 + $0x34] ss:$8 sps:$4 sm:$0xff]   ;;  %v2835_v6 = vld [vmem:[%s458_s13 + $0x30] ss:$8 sps:$4 sm:$0xff]   ;;  %v2836_v7 = vld [vmem:[%s458_s13 + $0x24] ss:$8 sps:$4 sm:$0xff]   ;;  %v442_v14 = vpack.c.bf16 %v3217_v13, %v3217_v13 }
  0x32   : > { %533 = vmatprep.subr.bf16.mxu0 %v2833_v5  ;;  %v2838_v8 = vld [vmem:[%s458_s13 + $0x20] ss:$8 sps:$4 sm:$0xff]   ;;  %v2839_v9 = vld [vmem:[%s458_s13 + $0x14] ss:$8 sps:$4 sm:$0xff]   ;;  %v2841_v10 = vld [vmem:[%s458_s13 + $0x10] ss:$8 sps:$4 sm:$0xff]  }
  0x33   : > { %534 = vmatpush1.bf16.msra.mxu0 %v2835_v6  ;;  %v2842_v11 = vld [vmem:[%s458_s13 + $0x4] ss:$8 sps:$4 sm:$0xff]   ;;  %v2844_v12 = vld [vmem:[%s458_s13] ss:$8 sps:$4 sm:$0xff]   ;;  %s3040_s13 = smov 120  }
  0x34   : > { %535 = vmatprep.subr.bf16.mxu0 %v2836_v7 }
  0x37   : > { %536 = vmatpush1.bf16.msra.mxu0 %v2838_v8 }
  0x38   : > { %537 = vmatprep.subr.bf16.mxu0 %v2839_v9 }
  0x3b   : > { %538 = vmatpush1.bf16.msra.mxu0 %v2841_v10 }
  0x3c   : > { %539 = vmatprep.subr.bf16.mxu0 %v2842_v11 }
  0x3f   : > { %540 = vmatpush1.bf16.msra.mxu0 %v2844_v12 }
  0x40   : > { %2581 = vmatprep.subr.bf16.mxu0 %v3038_v15 }
  0x42   : > { %2438 = vmatmul.mubr.msk.bf16.vlgmr.msra.gmra.mxu0 %vm521_vm1, %v442_v14 }
  0x43   : > { %2583 = vmatprep.mubr.msk.bf16.mxu0 %vm3039_vm2, %v3038_v15 }
 0x102   : > { %v559_v23 = vpop.f32.mrf.mxu0 }
 0x103   : > { %v560_v24 = vadd.f32 %v559_v23, %v474_v21 }
 0x104   : > { %v561_v25 = vpop.f32.mrf.mxu0 }
 0x105   : > { %v3244_v26 = vpack.c.bf16 %v560_v24, %v560_v24  ;;  %v562_v27 = vadd.f32 %v561_v25, %v478_v22 }
 0x106   : > { %v563_v28 = vpop.f32.mrf.mxu0 }
 0x107   : > { %v3246_v29 = vpack.c.bf16 %v562_v27, %v562_v27  ;;  %678 = vrot.lane.b32.xlu1 %v3244_v26, %s3040_s13  ;;  %569 = vrot.lane.b32.xlu0 %v3244_v26, %s3041_s16  ;;  %s3049_s16 = smov 88  }
 0x108   : > { %v564_v30 = vpop.f32.mrf.mxu0 }
 0x109   : > { %v635_v31 = vsel %vm633_vm3, %v3246_v29, 0 }
 0x10a   : > { %2588 = vmatpush3.bf16.msra.mxu1 %v635_v31 }
 0x10b   : > { %680 = vrot.lane.b32.xlu0 %v3244_v26, %s3042_s30  ;;  %2599 = vmatprep.subr.bf16.mxu1 %v3038_v15  ;;  %s3287_s30 = scalar_lea.vmem %s3591_s4, %s2502_s26  ;;  %s3046_s26 = smov 40  }
 0x10c   : > { %v448_v3 = vld [vmem:[%s3287_s30] sm:$0xf]  ;;  %v449_v6 = vld [vmem:[%s3287_s30 + $0x4] sm:$0xf] }
 0x10d   : > { %v840_v5 = vsel %vm633_vm3, %v448_v3, 0  ;;  %v794_v7 = vsel %vm633_vm3, %v449_v6, 0 }
 0x179   : > { %v570_v32 = vpop.permute.xlu0 %569  ;;  %v679_v36 = vpop.permute.xlu1 %678 }
 0x17a   : > { %v576_v33 = vsel %vm571_vm4, %v570_v32, 0 }
 0x17b   : > { %2582 = vmatpush3.bf16.xpose.msra.mxu0 %v576_v33 }
 0x17c   : > { %2593 = vmatprep.subr.bf16.mxu0 %v3038_v15 }
 0x17d   : > { %v681_v34 = vpop.permute.xlu0 %680 }
 0x17e   : > { %v686_v35 = vsel %vm571_vm4, %v681_v34, 0 }
 0x182   : > { %2584 = vmatmul.mubr.msk.bf16.vlgmr.msra.gmra.mxu0 %vm571_vm4, %v3244_v26 }
 0x183   : > { %2594 = vmatpush3.bf16.xpose.msra.mxu0 %v686_v35  ;;  %2595 = vmatprep.mubr.msk.bf16.mxu0 %vm3039_vm2, %v3038_v15 }
 0x184   : > { %2605 = vmatprep.subr.bf16.mxu0 %v3038_v15 }
 0x18a   : > { %2596 = vmatmul.mubr.msk.bf16.vlgmr.msra.gmra.mxu0 %vm571_vm4, %v679_v36 }
 0x18b   : > { %2607 = vmatprep.mubr.msk.bf16.mxu0 %vm3039_vm2, %v3038_v15  ;;  %2606 = vmatpush3.bf16.msra.mxu0 %v794_v7 }
 0x18c   : > { %2617 = vmatprep.subr.bf16.mxu0 %v3038_v15 }
 0x242   : > { %v612_v37 = vpop.f32.mrf.mxu0 }
 0x243   : > { %v618_v38 = vsel %vm571_vm4, %v612_v37, -inf }
 0x244   : > { %619 = vmax.xlane.f32.xlu1 %v618_v38  ;;  %v2585_v39 = vpop.f32.mrf.mxu0 }
 0x246   : > { %v615_v40 = vpop.f32.mrf.mxu0 }
 0x248   : > { %v2586_v41 = vpop.f32.mrf.mxu0 }
 0x24a   : > { %v722_v42 = vpop.f32.mrf.mxu0 }
 0x24b   : > { %v728_v43 = vsel %vm571_vm4, %v722_v42, -inf }
 0x24c   : > { %729 = vmax.xlane.f32.xlu0 %v728_v43  ;;  %v2597_v44 = vpop.f32.mrf.mxu0 }
 0x24e   : > { %v725_v45 = vpop.f32.mrf.mxu0 }
 0x250   : > { %v2598_v46 = vpop.f32.mrf.mxu0 }
 0x2cd   : > { %v620_v47 = vpop.xlane.xlu1 %619 }
 0x2ce   : > { %v621_v48 = vsub.f32 %v612_v37, %v620_v47 }
 0x2d0   : > { %v622_v49 = vmul.f32 1.442695, %v621_v48 }
 0x2d2   : > { %2873 = vpow2.f32 %v622_v49 }
 0x2d5   : > { %v730_v50 = vpop.xlane.xlu0 %729 }
 0x2d6   : > { %v731_v51 = vsub.f32 %v722_v42, %v730_v50 }
 0x2d8   : > { %v732_v52 = vmul.f32 1.442695, %v731_v51 }
 0x2da   : > { %2875 = vpow2.f32 %v732_v52 }
 0x2df   : > { %v2874_v53 = vpop.eup %2873 }
 0x2e0   : > { %v624_v54 = vsel %vm571_vm4, %v2874_v53, 0.0 }
 0x2e1   : > { %625 = vadd.xlane.f32.xlu0 %v624_v54 }
 0x2e7   : > { %v2876_v55 = vpop.eup %2875 }
 0x2e8   : > { %v734_v56 = vsel %vm571_vm4, %v2876_v55, 0.0 }
 0x2e9   : > { %735 = vadd.xlane.f32.xlu1 %v734_v56  ;;  %v450_v56 = vld [vmem:[%s3287_s30 + $0x8] sm:$0xf] }
 0x2f7   : > { %741 = vrot.lane.b32.xlu0 %v3246_v29, %s3040_s13  ;;  %s3048_s13 = smov 96  }
 0x2fa   : > { %884 = vrot.lane.b32.xlu1 %v3244_v26, %s3043_s18  ;;  %s3045_s18 = smov 104  }
 0x2fe   : > { %882 = vrot.lane.b32.xlu1 %v3244_v26, %s3044_s29 }
 0x36a   : > { %v626_v57 = vpop.xlane.xlu0 %625 }
 0x36b   : > { %2877 = vrcp.f32 %v626_v57  ;;  %v997_v57 = vsel %vm633_vm3, %v450_v56, 0 }
 0x36e   : > { %v742_v61 = vpop.permute.xlu0 %741 }
 0x36f   : > { %v747_v63 = vsel %vm633_vm3, %v742_v61, 0 }
 0x372   : > { %v736_v58 = vpop.xlane.xlu1 %735 }
 0x373   : > { %2879 = vrcp.f32 %v736_v58 }
 0x376   : > { %v885_v14 = vpop.permute.xlu1 %884 }
 0x377   : > { %v890_v22 = vsel %vm571_vm4, %v885_v14, 0 }
 0x378   : > { %v2878_v59 = vpop.eup %2877 }
 0x379   : > { %v628_v60 = vmul.f32 %v2878_v59, %v2874_v53 }
 0x37a   : > { %v883_v25 = vpop.permute.xlu1 %882 }
 0x37b   : > { %v629_v62 = vpack.c.bf16 %v628_v60, %v628_v60 }
 0x37d   : > { %2590 = vmatmul.mubr.msk.bf16.vlgmr.msra.gmra.mxu1 %vm571_vm4, %v629_v62 }
 0x37e   : > { %2600 = vmatpush3.bf16.msra.mxu1 %v747_v63  ;;  %2601 = vmatprep.mubr.msk.bf16.mxu1 %vm3039_vm2, %v3038_v15 }
 0x37f   : > { %2611 = vmatprep.subr.bf16.mxu1 %v3038_v15 }
 0x380   : > { %v2880_v0 = vpop.eup %2879 }
 0x381   : > { %v738_v1 = vmul.f32 %v2880_v0, %v2876_v55 }
 0x383   : > { %v739_v2 = vpack.c.bf16 %v738_v1, %v738_v1 }
 0x385   : > { %2602 = vmatmul.mubr.msk.bf16.vlgmr.msra.gmra.mxu1 %vm571_vm4, %v739_v2 }
 0x386   : > { %2613 = vmatprep.mubr.msk.bf16.mxu1 %vm3039_vm2, %v3038_v15  ;;  %2612 = vmatpush3.bf16.msra.mxu1 %v840_v5 }
 0x387   : > { %2623 = vmatprep.subr.bf16.mxu1 %v3038_v15 }
 0x43d   : > { %v671_v8 = vpop.f32.mrf.mxu1 }
 0x43e   : > { %v677_v9 = vpack.c.bf16 %v671_v8, %v671_v8 }
 0x43f   : > { %v2591_v10 = vpop.f32.mrf.mxu1 }
 0x440   : > { %2614 = vmatmul.mubr.msk.bf16.vlgmr.msra.gmra.mxu1 %vm571_vm4, %v677_v9 }
 0x441   : > { %v674_v11 = vpop.f32.mrf.mxu1  ;;  %2625 = vmatprep.mubr.msk.bf16.mxu1 %vm3039_vm2, %v3038_v15 }
 0x443   : > { %v2592_v12 = vpop.f32.mrf.mxu1 }
 0x445   : > { %v783_v16 = vpop.f32.mrf.mxu1 }
 0x446   : > { %v789_v19 = vpack.c.bf16 %v783_v16, %v783_v16 }
 0x447   : > { %v2603_v21 = vpop.f32.mrf.mxu1 }
 0x448   : > { %2608 = vmatmul.mubr.msk.bf16.vlgmr.msra.gmra.mxu0 %vm571_vm4, %v789_v19 }
 0x449   : > { %2618 = vmatpush3.bf16.xpose.msra.mxu0 %v890_v22  ;;  %v786_v23 = vpop.f32.mrf.mxu1  ;;  %2619 = vmatprep.mubr.msk.bf16.mxu0 %vm3039_vm2, %v3038_v15 }
 0x44a   : > { %2629 = vmatprep.subr.bf16.mxu0 %v3038_v15 }
 0x44b   : > { %v2604_v24 = vpop.f32.mrf.mxu1 }
 0x450   : > { %2620 = vmatmul.mubr.msk.bf16.vlgmr.msra.gmra.mxu0 %vm571_vm4, %v883_v25 }
 0x451   : > { %2631 = vmatprep.mubr.msk.bf16.mxu0 %vm3039_vm2, %v3038_v15  ;;  %2630 = vmatpush3.bf16.msra.mxu0 %v997_v57 }
 0x452   : > { %2641 = vmatprep.subr.bf16.mxu0 %v3038_v15 }
 0x500   : > { %v876_v27 = vpop.f32.mrf.mxu1 }
 0x502   : > { %v2615_v28 = vpop.f32.mrf.mxu1 }
 0x504   : > { %v879_v30 = vpop.f32.mrf.mxu1 }
 0x506   : > { %v2616_v31 = vpop.f32.mrf.mxu1 }
 0x507   : > { %v451_v31 = vld [vmem:[%s3287_s30 + $0xc] sm:$0xf] }
 0x508   : > { %v830_v32 = vpop.f32.mrf.mxu0 }
 0x509   : > { %v3306_v33 = vadd.f32 %v876_v27, %v830_v32  ;;  %v1155_v32 = vsel %vm633_vm3, %v451_v31, 0 }
 0x50a   : > { %v2609_v34 = vpop.f32.mrf.mxu0 }
 0x50c   : > { %v833_v35 = vpop.f32.mrf.mxu0 }
 0x50e   : > { %v2610_v36 = vpop.f32.mrf.mxu0 }
 0x510   : > { %v926_v37 = vpop.f32.mrf.mxu0 }
 0x511   : > { %v932_v38 = vsel %vm571_vm4, %v926_v37, -inf }
 0x512   : > { %933 = vmax.xlane.f32.xlu0 %v932_v38  ;;  %v2621_v39 = vpop.f32.mrf.mxu0 }
 0x514   : > { %v929_v40 = vpop.f32.mrf.mxu0 }
 0x516   : > { %v2622_v41 = vpop.f32.mrf.mxu0 }
 0x528   : > { %944 = vrot.lane.b32.xlu0 %v3246_v29, %s3044_s29  ;;  %s3047_s29 = smov 32  }
 0x52c   : > { %1040 = vrot.lane.b32.xlu0 %v3244_v26, %s3045_s18 }
 0x59b   : > { %v934_v42 = vpop.xlane.xlu0 %933 }
 0x59c   : > { %v935_v43 = vsub.f32 %v926_v37, %v934_v42 }
 0x59e   : > { %v936_v44 = vmul.f32 1.442695, %v935_v43 }
 0x59f   : > { %v945_v45 = vpop.permute.xlu0 %944 }
 0x5a0   : > { %2881 = vpow2.f32 %v936_v44  ;;  %v950_v46 = vsel %vm633_vm3, %v945_v45, 0 }
 0x5a1   : > { %2624 = vmatpush3.bf16.msra.mxu1 %v950_v46 }
 0x5a2   : > { %2635 = vmatprep.subr.bf16.mxu1 %v3038_v15 }
 0x5a3   : > { %v1041_v55 = vpop.permute.xlu0 %1040 }
 0x5ad   : > { %v2882_v47 = vpop.eup %2881 }
 0x5ae   : > { %v938_v48 = vsel %vm571_vm4, %v2882_v47, 0.0 }
 0x5af   : > { %939 = vadd.xlane.f32.xlu1 %v938_v48 }
 0x5c0   : > { %1042 = vrot.lane.b32.xlu1 %v3244_v26, %s3046_s26  ;;  %s3051_s26 = smov 16  }
 0x638   : > { %v940_v49 = vpop.xlane.xlu1 %939 }
 0x639   : > { %2883 = vrcp.f32 %v940_v49 }
 0x63c   : > { %v1043_v52 = vpop.permute.xlu1 %1042 }
 0x63d   : > { %v1048_v54 = vsel %vm571_vm4, %v1043_v52, 0 }
 0x646   : > { %v2884_v50 = vpop.eup %2883 }
 0x647   : > { %v942_v51 = vmul.f32 %v2884_v50, %v2882_v47 }
 0x649   : > { %v943_v53 = vpack.c.bf16 %v942_v51, %v942_v51 }
 0x64b   : > { %2626 = vmatmul.mubr.msk.bf16.vlgmr.msra.gmra.mxu1 %vm571_vm4, %v943_v53 }
 0x64c   : > { %2636 = vmatpush3.bf16.xpose.msra.mxu1 %v1048_v54  ;;  %2637 = vmatprep.mubr.msk.bf16.mxu1 %vm3039_vm2, %v3038_v15 }
 0x64d   : > { %2647 = vmatprep.subr.bf16.mxu1 %v3038_v15 }
 0x653   : > { %2638 = vmatmul.mubr.msk.bf16.vlgmr.msra.gmra.mxu1 %vm571_vm4, %v1041_v55 }
 0x654   : > { %2649 = vmatprep.mubr.msk.bf16.mxu1 %vm3039_vm2, %v3038_v15  ;;  %2648 = vmatpush3.bf16.msra.mxu1 %v1155_v32 }
 0x655   : > { %2659 = vmatprep.subr.bf16.mxu1 %v3038_v15 }
 0x70b   : > { %v986_v58 = vpop.f32.mrf.mxu1 }
 0x70c   : > { %v992_v59 = vpack.c.bf16 %v986_v58, %v986_v58 }
 0x70d   : > { %v2627_v60 = vpop.f32.mrf.mxu1 }
 0x70e   : > { %2632 = vmatmul.mubr.msk.bf16.vlgmr.msra.gmra.mxu0 %vm571_vm4, %v992_v59 }
 0x70f   : > { %v989_v61 = vpop.f32.mrf.mxu1  ;;  %2643 = vmatprep.mubr.msk.bf16.mxu0 %vm3039_vm2, %v3038_v15 }
 0x711   : > { %v2628_v62 = vpop.f32.mrf.mxu1 }
 0x712   : > { %v452_v62 = vld [vmem:[%s3287_s30 + $0x10] sm:$0xf] }
 0x713   : > { %v1084_v63 = vpop.f32.mrf.mxu1 }
 0x714   : > { %v1090_v0 = vsel %vm571_vm4, %v1084_v63, -inf }
 0x715   : > { %1091 = vmax.xlane.f32.xlu1 %v1090_v0  ;;  %v2639_v1 = vpop.f32.mrf.mxu1 }
 0x717   : > { %v1087_v2 = vpop.f32.mrf.mxu1 }
 0x719   : > { %v2640_v3 = vpop.f32.mrf.mxu1 }
 0x726   : > { %1200 = vrot.lane.b32.xlu1 %v3244_v26, %s3047_s29  ;;  %s3052_s29 = smov 80  }
 0x72a   : > { %1198 = vrot.lane.b32.xlu1 %v3244_v26, %s3048_s13 }
 0x79e   : > { %v1092_v5 = vpop.xlane.xlu1 %1091 }
 0x79f   : > { %v1093_v6 = vsub.f32 %v1084_v63, %v1092_v5  ;;  %v1313_v63 = vsel %vm633_vm3, %v452_v62, 0 }
 0x7a1   : > { %v1094_v7 = vmul.f32 1.442695, %v1093_v6 }
 0x7a2   : > { %v1201_v25 = vpop.permute.xlu1 %1200 }
 0x7a3   : > { %2885 = vpow2.f32 %v1094_v7  ;;  %v1206_v28 = vsel %vm571_vm4, %v1201_v25, 0 }
 0x7a6   : > { %v1199_v30 = vpop.permute.xlu1 %1198 }
 0x7b0   : > { %v2886_v8 = vpop.eup %2885 }
 0x7b1   : > { %v1096_v9 = vsel %vm571_vm4, %v2886_v8, 0.0 }
 0x7b2   : > { %1097 = vadd.xlane.f32.xlu0 %v1096_v9 }
 0x7c8   : > { %1102 = vrot.lane.b32.xlu0 %v3246_v29, %s3045_s18  ;;  %s3050_s18 = smov 24  }
 0x7ce   : > { %v1033_v10 = vpop.f32.mrf.mxu0 }
 0x7cf   : > { %v1039_v11 = vadd.f32 %v1033_v10, %v3306_v33 }
 0x7d0   : > { %v2633_v12 = vpop.f32.mrf.mxu0 }
 0x7d2   : > { %v1036_v14 = vpop.f32.mrf.mxu0 }
 0x7d4   : > { %v2634_v16 = vpop.f32.mrf.mxu0 }
 0x83b   : > { %v1098_v19 = vpop.xlane.xlu0 %1097 }
 0x83c   : > { %2887 = vrcp.f32 %v1098_v19 }
 0x83f   : > { %v1103_v21 = vpop.permute.xlu0 %1102 }
 0x840   : > { %v1108_v22 = vsel %vm633_vm3, %v1103_v21, 0 }
 0x841   : > { %2642 = vmatpush3.bf16.msra.mxu0 %v1108_v22 }
 0x842   : > { %2653 = vmatprep.subr.bf16.mxu0 %v3038_v15 }
 0x849   : > { %v2888_v23 = vpop.eup %2887 }
 0x84a   : > { %v1100_v24 = vmul.f32 %v2888_v23, %v2886_v8 }
 0x84c   : > { %v1101_v27 = vpack.c.bf16 %v1100_v24, %v1100_v24 }
 0x84e   : > { %2644 = vmatmul.mubr.msk.bf16.vlgmr.msra.gmra.mxu0 %vm571_vm4, %v1101_v27 }
 0x84f   : > { %2654 = vmatpush3.bf16.xpose.msra.mxu0 %v1206_v28  ;;  %2655 = vmatprep.mubr.msk.bf16.mxu0 %vm3039_vm2, %v3038_v15 }
 0x850   : > { %2665 = vmatprep.subr.bf16.mxu0 %v3038_v15 }
 0x856   : > { %2656 = vmatmul.mubr.msk.bf16.vlgmr.msra.gmra.mxu0 %vm571_vm4, %v1199_v30 }
 0x857   : > { %2667 = vmatprep.mubr.msk.bf16.mxu0 %vm3039_vm2, %v3038_v15  ;;  %2666 = vmatpush3.bf16.msra.mxu0 %v1313_v63 }
 0x858   : > { %2677 = vmatprep.subr.bf16.mxu0 %v3038_v15 }
 0x90e   : > { %v1144_v33 = vpop.f32.mrf.mxu0 }
 0x90f   : > { %v1150_v34 = vpack.c.bf16 %v1144_v33, %v1144_v33 }
 0x910   : > { %v2645_v35 = vpop.f32.mrf.mxu0 }
 0x911   : > { %2650 = vmatmul.mubr.msk.bf16.vlgmr.msra.gmra.mxu1 %vm571_vm4, %v1150_v34 }
 0x912   : > { %v1147_v36 = vpop.f32.mrf.mxu0  ;;  %2661 = vmatprep.mubr.msk.bf16.mxu1 %vm3039_vm2, %v3038_v15 }
 0x914   : > { %v2646_v37 = vpop.f32.mrf.mxu0 }
 0x915   : > { %v453_v37 = vld [vmem:[%s3287_s30 + $0x14] sm:$0xf] }
 0x916   : > { %v1242_v38 = vpop.f32.mrf.mxu0 }
 0x917   : > { %v1248_v39 = vsel %vm571_vm4, %v1242_v38, -inf }
 0x918   : > { %1249 = vmax.xlane.f32.xlu0 %v1248_v39  ;;  %v2657_v40 = vpop.f32.mrf.mxu0 }
 0x91a   : > { %v1245_v41 = vpop.f32.mrf.mxu0 }
 0x91c   : > { %v2658_v42 = vpop.f32.mrf.mxu0 }
 0x92e   : > { %1260 = vrot.lane.b32.xlu0 %v3246_v29, %s3048_s13  ;;  %s3053_s13 = smov 72  }
 0x932   : > { %1356 = vrot.lane.b32.xlu0 %v3244_v26, %s3049_s16 }
 0x9a1   : > { %v1250_v43 = vpop.xlane.xlu0 %1249 }
 0x9a2   : > { %v1251_v44 = vsub.f32 %v1242_v38, %v1250_v43  ;;  %v1471_v38 = vsel %vm633_vm3, %v453_v37, 0 }
 0x9a4   : > { %v1252_v45 = vmul.f32 1.442695, %v1251_v44 }
 0x9a5   : > { %v1261_v46 = vpop.permute.xlu0 %1260 }
 0x9a6   : > { %2889 = vpow2.f32 %v1252_v45  ;;  %v1266_v47 = vsel %vm633_vm3, %v1261_v46, 0 }
 0x9a7   : > { %2660 = vmatpush3.bf16.msra.mxu1 %v1266_v47 }
 0x9a8   : > { %2671 = vmatprep.subr.bf16.mxu1 %v3038_v15 }
 0x9a9   : > { %v1357_v61 = vpop.permute.xlu0 %1356 }
 0x9b3   : > { %v2890_v48 = vpop.eup %2889 }
 0x9b4   : > { %v1254_v49 = vsel %vm571_vm4, %v2890_v48, 0.0 }
 0x9b5   : > { %1255 = vadd.xlane.f32.xlu1 %v1254_v49 }
 0x9c6   : > { %1358 = vrot.lane.b32.xlu1 %v3244_v26, %s3050_s18 }
 0x9d1   : > { %v1191_v50 = vpop.f32.mrf.mxu1 }
 0x9d2   : > { %v1197_v51 = vadd.f32 %v1191_v50, %v1039_v11 }
 0x9d3   : > { %v2651_v52 = vpop.f32.mrf.mxu1 }
 0x9d5   : > { %v1194_v53 = vpop.f32.mrf.mxu1 }
 0x9d7   : > { %v2652_v54 = vpop.f32.mrf.mxu1 }
 0xa3e   : > { %v1256_v55 = vpop.xlane.xlu1 %1255 }
 0xa3f   : > { %2891 = vrcp.f32 %v1256_v55 }
 0xa42   : > { %v1359_v58 = vpop.permute.xlu1 %1358 }
 0xa43   : > { %v1364_v60 = vsel %vm571_vm4, %v1359_v58, 0 }
 0xa4c   : > { %v2892_v56 = vpop.eup %2891 }
 0xa4d   : > { %v1258_v57 = vmul.f32 %v2892_v56, %v2890_v48 }
 0xa4f   : > { %v1259_v59 = vpack.c.bf16 %v1258_v57, %v1258_v57 }
 0xa51   : > { %2662 = vmatmul.mubr.msk.bf16.vlgmr.msra.gmra.mxu1 %vm571_vm4, %v1259_v59 }
 0xa52   : > { %2672 = vmatpush3.bf16.xpose.msra.mxu1 %v1364_v60  ;;  %2673 = vmatprep.mubr.msk.bf16.mxu1 %vm3039_vm2, %v3038_v15 }
 0xa53   : > { %2683 = vmatprep.subr.bf16.mxu1 %v3038_v15 }
 0xa59   : > { %2674 = vmatmul.mubr.msk.bf16.vlgmr.msra.gmra.mxu1 %vm571_vm4, %v1357_v61 }
 0xa5a   : > { %2685 = vmatprep.mubr.msk.bf16.mxu1 %vm3039_vm2, %v3038_v15  ;;  %2684 = vmatpush3.bf16.msra.mxu1 %v1471_v38 }
 0xa5b   : > { %2695 = vmatprep.subr.bf16.mxu1 %v3038_v15 }
 0xb11   : > { %v1302_v0 = vpop.f32.mrf.mxu1 }
 0xb12   : > { %v1308_v1 = vpack.c.bf16 %v1302_v0, %v1302_v0 }
 0xb13   : > { %v2663_v2 = vpop.f32.mrf.mxu1 }
 0xb14   : > { %2668 = vmatmul.mubr.msk.bf16.vlgmr.msra.gmra.mxu0 %vm571_vm4, %v1308_v1 }
 0xb15   : > { %v1305_v3 = vpop.f32.mrf.mxu1  ;;  %2679 = vmatprep.mubr.msk.bf16.mxu0 %vm3039_vm2, %v3038_v15 }
 0xb16   : > { %v454_v3 = vld [vmem:[%s3287_s30 + $0x18] sm:$0xf] }
 0xb17   : > { %v2664_v5 = vpop.f32.mrf.mxu1 }
 0xb18   : > { %v1629_v5 = vsel %vm633_vm3, %v454_v3, 0 }
 0xb19   : > { %v1400_v6 = vpop.f32.mrf.mxu1 }
 0xb1a   : > { %v1406_v7 = vsel %vm571_vm4, %v1400_v6, -inf }
 0xb1b   : > { %1407 = vmax.xlane.f32.xlu1 %v1406_v7  ;;  %v2675_v8 = vpop.f32.mrf.mxu1 }
 0xb1d   : > { %v1403_v9 = vpop.f32.mrf.mxu1 }
 0xb1f   : > { %v2676_v10 = vpop.f32.mrf.mxu1 }
 0xb2c   : > { %1516 = vrot.lane.b32.xlu1 %v3244_v26, %s3051_s26 }
 0xb30   : > { %1514 = vrot.lane.b32.xlu1 %v3244_v26, %s3052_s29 }
 0xba4   : > { %v1408_v11 = vpop.xlane.xlu1 %1407 }
 0xba5   : > { %v1409_v12 = vsub.f32 %v1400_v6, %v1408_v11 }
 0xba7   : > { %v1410_v14 = vmul.f32 1.442695, %v1409_v12 }
 0xba8   : > { %v1517_v33 = vpop.permute.xlu1 %1516 }
 0xba9   : > { %2893 = vpow2.f32 %v1410_v14  ;;  %v1522_v35 = vsel %vm571_vm4, %v1517_v33, 0 }
 0xbac   : > { %v1515_v36 = vpop.permute.xlu1 %1514 }
 0xbb6   : > { %v2894_v16 = vpop.eup %2893 }
 0xbb7   : > { %v1412_v19 = vsel %vm571_vm4, %v2894_v16, 0.0 }
 0xbb8   : > { %1413 = vadd.xlane.f32.xlu0 %v1412_v19 }
 0xbce   : > { %1418 = vrot.lane.b32.xlu0 %v3246_v29, %s3049_s16  ;;  %s3054_s16 = smov 8  }
 0xbd4   : > { %v1349_v21 = vpop.f32.mrf.mxu0 }
 0xbd5   : > { %v1355_v22 = vadd.f32 %v1349_v21, %v1197_v51 }
 0xbd6   : > { %v2669_v23 = vpop.f32.mrf.mxu0 }
 0xbd8   : > { %v1352_v24 = vpop.f32.mrf.mxu0 }
 0xbda   : > { %v2670_v25 = vpop.f32.mrf.mxu0 }
 0xc41   : > { %v1414_v27 = vpop.xlane.xlu0 %1413 }
 0xc42   : > { %2895 = vrcp.f32 %v1414_v27  ;;  %v455_v27 = vld [vmem:[%s3287_s30 + $0x1c] sm:$0xf]  ;;  %s2425_s30 = sshll.u32 %s3019_s24, 3 }
 0xc45   : > { %v1419_v28 = vpop.permute.xlu0 %1418 }
 0xc46   : > { %v1424_v30 = vsel %vm633_vm3, %v1419_v28, 0 }
 0xc47   : > { %2678 = vmatpush3.bf16.msra.mxu0 %v1424_v30  ;;  %v1787_v30 = vsel %vm633_vm3, %v455_v27, 0 }
 0xc48   : > { %2689 = vmatprep.subr.bf16.mxu0 %v3038_v15 }
 0xc4f   : > { %v2896_v31 = vpop.eup %2895 }
 0xc50   : > { %v1416_v32 = vmul.f32 %v2896_v31, %v2894_v16 }
 0xc52   : > { %v1417_v34 = vpack.c.bf16 %v1416_v32, %v1416_v32 }
 0xc54   : > { %2680 = vmatmul.mubr.msk.bf16.vlgmr.msra.gmra.mxu0 %vm571_vm4, %v1417_v34 }
 0xc55   : > { %2690 = vmatpush3.bf16.xpose.msra.mxu0 %v1522_v35  ;;  %2691 = vmatprep.mubr.msk.bf16.mxu0 %vm3039_vm2, %v3038_v15 }
 0xc56   : > { %2701 = vmatprep.subr.bf16.mxu0 %v3038_v15 }
 0xc5c   : > { %2692 = vmatmul.mubr.msk.bf16.vlgmr.msra.gmra.mxu0 %vm571_vm4, %v1515_v36 }
 0xc5d   : > { %2703 = vmatprep.mubr.msk.bf16.mxu0 %vm3039_vm2, %v3038_v15  ;;  %2702 = vmatpush3.bf16.msra.mxu0 %v1629_v5 }
 0xc5e   : > { %2713 = vmatprep.subr.bf16.mxu0 %v3038_v15 }
 0xd14   : > { %v1460_v39 = vpop.f32.mrf.mxu0 }
 0xd15   : > { %v1466_v40 = vpack.c.bf16 %v1460_v39, %v1460_v39 }
 0xd16   : > { %v2681_v41 = vpop.f32.mrf.mxu0 }
 0xd17   : > { %2686 = vmatmul.mubr.msk.bf16.vlgmr.msra.gmra.mxu1 %vm571_vm4, %v1466_v40 }
 0xd18   : > { %v1463_v42 = vpop.f32.mrf.mxu0  ;;  %2697 = vmatprep.mubr.msk.bf16.mxu1 %vm3039_vm2, %v3038_v15 }
 0xd1a   : > { %v2682_v43 = vpop.f32.mrf.mxu0 }
 0xd1c   : > { %v1558_v44 = vpop.f32.mrf.mxu0 }
 0xd1d   : > { %v1564_v45 = vsel %vm571_vm4, %v1558_v44, -inf }
 0xd1e   : > { %1565 = vmax.xlane.f32.xlu0 %v1564_v45  ;;  %v2693_v46 = vpop.f32.mrf.mxu0 }
 0xd20   : > { %v1561_v47 = vpop.f32.mrf.mxu0 }
 0xd22   : > { %v2694_v48 = vpop.f32.mrf.mxu0 }
 0xd34   : > { %1576 = vrot.lane.b32.xlu0 %v3246_v29, %s3052_s29  ;;  %s444_s29 = scalar_lea.vmem %s3592_s5, %s2425_s30 }
 0xd38   : > { %1672 = vrot.lane.b32.xlu0 %v3244_v26, %s3053_s13 }
 0xda7   : > { %v1566_v49 = vpop.xlane.xlu0 %1565 }
 0xda8   : > { %v1567_v50 = vsub.f32 %v1558_v44, %v1566_v49  ;;  %v3438_v44 = vld [vmem:[%s444_s29] sm:$0xff]  ;;  %s1871_s29 = scalar_lea.vmem %s3594_s7, %s2429_s19 }
 0xdaa   : > { %v1568_v51 = vmul.f32 1.442695, %v1567_v50 }
 0xdab   : > { %v1577_v52 = vpop.permute.xlu0 %1576 }
 0xdac   : > { %2897 = vpow2.f32 %v1568_v51  ;;  %v1582_v53 = vsel %vm633_vm3, %v1577_v52, 0 }
 0xdad   : > { %2696 = vmatpush3.bf16.msra.mxu1 %v1582_v53 }
 0xdae   : > { %2707 = vmatprep.subr.bf16.mxu1 %v3038_v15 }
 0xdb9   : > { %v2898_v54 = vpop.eup %2897 }
 0xdba   : > { %v1570_v55 = vsel %vm571_vm4, %v2898_v54, 0.0 }
 0xdbb   : > { %1571 = vadd.xlane.f32.xlu1 %v1570_v55 }
 0xdcc   : > { %1674 = vrot.lane.b32.xlu1 %v3244_v26, %s3054_s16  ;;  %v1673_v26 = vpop.permute.xlu0 %1672 }
 0xdd7   : > { %v1507_v56 = vpop.f32.mrf.mxu1 }
 0xdd8   : > { %v1513_v57 = vadd.f32 %v1507_v56, %v1355_v22 }
 0xdd9   : > { %v2687_v58 = vpop.f32.mrf.mxu1 }
 0xdda   : > { %v2845_v58 = vld [vmem:[%s3215_s17 + $0x30] ss:$8 sps:$4 sm:$0xff]  }
 0xddb   : > { %v1510_v59 = vpop.f32.mrf.mxu1 }
 0xddc   : > { %v2850_v59 = vld [vmem:[%s3215_s17 + $0x24] ss:$8 sps:$4 sm:$0xff]  }
 0xddd   : > { %v2688_v60 = vpop.f32.mrf.mxu1 }
 0xdde   : > { %v2848_v60 = vld [vmem:[%s3215_s17 + $0x20] ss:$8 sps:$4 sm:$0xff]  }
 0xe44   : > { %v1572_v61 = vpop.xlane.xlu1 %1571 }
 0xe45   : > { %2899 = vrcp.f32 %v1572_v61  ;;  %v2853_v61 = vld [vmem:[%s3215_s17 + $0x14] ss:$8 sps:$4 sm:$0xff]  }
 0xe48   : > { %v1675_v0 = vpop.permute.xlu1 %1674 }
 0xe49   : > { %v1680_v2 = vsel %vm571_vm4, %v1675_v0, 0  ;;  %v2854_v0 = vld [vmem:[%s3215_s17] ss:$8 sps:$4 sm:$0xff]  }
 0xe52   : > { %v2900_v62 = vpop.eup %2899 }
 0xe53   : > { %v1574_v63 = vmul.f32 %v2900_v62, %v2898_v54  ;;  %v2851_v62 = vld [vmem:[%s3215_s17 + $0x10] ss:$8 sps:$4 sm:$0xff]  }
 0xe55   : > { %v1575_v1 = vpack.c.bf16 %v1574_v63, %v1574_v63  ;;  %v2856_v63 = vld [vmem:[%s3215_s17 + $0x4] ss:$8 sps:$4 sm:$0xff]  }
 0xe57   : > { %2698 = vmatmul.mubr.msk.bf16.vlgmr.msra.gmra.mxu1 %vm571_vm4, %v1575_v1 }
 0xe58   : > { %2708 = vmatpush3.bf16.xpose.msra.mxu1 %v1680_v2  ;;  %2709 = vmatprep.mubr.msk.bf16.mxu1 %vm3039_vm2, %v3038_v15 }
 0xe59   : > { %2719 = vmatprep.subr.bf16.mxu1 %v3038_v15 }
 0xe5f   : > { %2710 = vmatmul.mubr.msk.bf16.vlgmr.msra.gmra.mxu1 %vm571_vm4, %v1673_v26 }
 0xe60   : > { %2721 = vmatprep.mubr.msk.bf16.mxu1 %vm3039_vm2, %v3038_v15  ;;  %2720 = vmatpush3.bf16.msra.mxu1 %v1787_v30 }
 0xf17   : > { %v1618_v6 = vpop.f32.mrf.mxu1 }
 0xf18   : > { %v1624_v7 = vpack.c.bf16 %v1618_v6, %v1618_v6 }
 0xf19   : > { %v2699_v8 = vpop.f32.mrf.mxu1 }
 0xf1a   : > { %2704 = vmatmul.mubr.msk.bf16.vlgmr.msra.gmra.mxu0 %vm571_vm4, %v1624_v7 }
 0xf1b   : > { %v1621_v9 = vpop.f32.mrf.mxu1  ;;  %2715 = vmatprep.mubr.msk.bf16.mxu0 %vm3039_vm2, %v3038_v15 }
 0xf1d   : > { %v2700_v10 = vpop.f32.mrf.mxu1 }
 0xf1f   : > { %v1716_v11 = vpop.f32.mrf.mxu1 }
 0xf20   : > { %v1722_v12 = vsel %vm571_vm4, %v1716_v11, -inf }
 0xf21   : > { %1723 = vmax.xlane.f32.xlu1 %v1722_v12  ;;  %v2711_v14 = vpop.f32.mrf.mxu1 }
 0xf23   : > { %v1719_v16 = vpop.f32.mrf.mxu1 }
 0xf25   : > { %v2712_v19 = vpop.f32.mrf.mxu1 }
 0xfaa   : > { %v1724_v21 = vpop.xlane.xlu1 %1723 }
 0xfab   : > { %v1725_v22 = vsub.f32 %v1716_v11, %v1724_v21  ;;  %v1852_v21 = vsub.s32 2, %v3225_v17 }
 0xfad   : > { %v1726_v23 = vmul.f32 1.442695, %v1725_v22  ;;  %v1857_v22 = vsub.s32 3, %v3225_v17 }
 0xfaf   : > { %2901 = vpow2.f32 %v1726_v23  ;;  %v1853_v23 = vrot.slane %v3438_v44, %v1852_v21 }
 0xfbc   : > { %v2902_v24 = vpop.eup %2901 }
 0xfbd   : > { %v1728_v25 = vsel %vm571_vm4, %v2902_v24, 0.0 }
 0xfbe   : > { %1729 = vadd.xlane.f32.xlu0 %v1728_v25 }
 0xfd4   : > { %1734 = vrot.lane.b32.xlu0 %v3246_v29, %s3053_s13  ;;  %s2505_s13 = sshll.u32 %s3019_s24, 7 }
 0xfd5   : > { %s3457_s18 = scalar_lea.vmem %s3595_s8, %s2505_s13 }
 0xfd6   : > { %v2857_v1 = vld [vmem:[%s3457_s18 + $0x78] sm:$0xff]   ;;  %v2859_v26 = vld [vmem:[%s3457_s18 + $0x70] sm:$0xff]   ;;  %v2861_v5 = vld [vmem:[%s3457_s18 + $0x68] sm:$0xff]  }
 0xfd7   : > { %v2858_v2 = vld [vmem:[%s3457_s18 + $0x38] sm:$0xff]   ;;  %2554 = vmatprep.subr.bf16.mxu1 %v2857_v1  ;;  %v2860_v3 = vld [vmem:[%s3457_s18 + $0x30] sm:$0xff]   ;;  %v2862_v6 = vld [vmem:[%s3457_s18 + $0x28] sm:$0xff]  }
 0xfd8   : > { %v2863_v7 = vld [vmem:[%s3457_s18 + $0x60] sm:$0xff]   ;;  %v2865_v9 = vld [vmem:[%s3457_s18 + $0x58] sm:$0xff]   ;;  %v2867_v11 = vld [vmem:[%s3457_s18 + $0x50] sm:$0xff]  }
 0xfd9   : > { %v2864_v8 = vld [vmem:[%s3457_s18 + $0x20] sm:$0xff]   ;;  %v2866_v10 = vld [vmem:[%s3457_s18 + $0x18] sm:$0xff]   ;;  %v2868_v12 = vld [vmem:[%s3457_s18 + $0x10] sm:$0xff]  }
 0xfda   : > { %v1665_v15 = vpop.f32.mrf.mxu0 }
 0xfdb   : > { %v1671_v28 = vadd.f32 %v1665_v15, %v1513_v57  ;;  %v1858_v15 = vrot.slane %v3438_v44, %v1857_v22 }
 0xfdc   : > { %v2705_v31 = vpop.f32.mrf.mxu0 }
 0xfdd   : > { %v2869_v31 = vld [vmem:[%s3457_s18 + $0x48] sm:$0xff]  }
 0xfde   : > { %v1668_v32 = vpop.f32.mrf.mxu0 }
 0xfdf   : > { %v2870_v32 = vld [vmem:[%s3457_s18 + $0x8] sm:$0xff]  }
 0xfe0   : > { %v2706_v33 = vpop.f32.mrf.mxu0 }
 0xfe1   : > { %v2871_v33 = vld [vmem:[%s3457_s18 + $0x40] sm:$0xff]  }
0x1047   : > { %v1730_v34 = vpop.xlane.xlu0 %1729 }
0x1048   : > { %2903 = vrcp.f32 %v1730_v34  ;;  %v2872_v34 = vld [vmem:[%s3457_s18] sm:$0xff]  }
0x104b   : > { %v1735_v35 = vpop.permute.xlu0 %1734 }
0x104c   : > { %v1740_v36 = vsel %vm633_vm3, %v1735_v35, 0  ;;  %v1872_v35 = vld [vmem:[%s1871_s29] sm:$0x3] }
0x104d   : > { %2714 = vmatpush3.bf16.msra.mxu0 %v1740_v36  ;;  %v1877_v36 = vrot.slane %v1872_v35, %v3233_v18 }
0x1055   : > { %v2904_v37 = vpop.eup %2903 }
0x1056   : > { %v1732_v38 = vmul.f32 %v2904_v37, %v2902_v24  ;;  %v1881_v37 = vrot.slane %v1872_v35, %v3236_v20 }
0x1058   : > { %v1733_v39 = vpack.c.bf16 %v1732_v38, %v1732_v38 }
0x105a   : > { %2716 = vmatmul.mubr.msk.bf16.vlgmr.msra.gmra.mxu0 %vm571_vm4, %v1733_v39 }
0x105b   : > { %1959 = vmatprep.mubr.bf16.mxu0 %v3037_v4  ;;  %v1834_v4 = vrot.slane %v3438_v44, %v3233_v18 }
0x111a   : > { %v1776_v29 = vpop.f32.mrf.mxu0 }
0x111b   : > { %v1782_v40 = vpack.c.bf16 %v1776_v29, %v1776_v29 }
0x111c   : > { %v2717_v41 = vpop.f32.mrf.mxu0 }
0x111d   : > { %2722 = vmatmul.mubr.msk.bf16.vlgmr.msra.gmra.mxu1 %vm571_vm4, %v1782_v40 }
0x111e   : > { %v1779_v42 = vpop.f32.mrf.mxu0  ;;  %2555 = vmatpush3.bf16.msra.mxu1 %v2858_v2 }
0x111f   : > { %2556 = vmatprep.subr.bf16.mxu1 %v2859_v26 }
0x1120   : > { %v2718_v43 = vpop.f32.mrf.mxu0 }
0x1122   : > { %2557 = vmatpush3.bf16.msra.mxu1 %v2860_v3 }
0x1123   : > { %2558 = vmatprep.subr.bf16.mxu1 %v2861_v5 }
0x1126   : > { %2559 = vmatpush3.bf16.msra.mxu1 %v2862_v6 }
0x1127   : > { %2560 = vmatprep.subr.bf16.mxu1 %v2863_v7 }
0x112a   : > { %2561 = vmatpush3.bf16.msra.mxu1 %v2864_v8 }
0x112b   : > { %2562 = vmatprep.subr.bf16.mxu1 %v2865_v9 }
0x112e   : > { %2563 = vmatpush3.bf16.msra.mxu1 %v2866_v10 }
0x112f   : > { %2564 = vmatprep.subr.bf16.mxu1 %v2867_v11 }
0x1132   : > { %2565 = vmatpush3.bf16.msra.mxu1 %v2868_v12 }
0x1133   : > { %2566 = vmatprep.subr.bf16.mxu1 %v2869_v31 }
0x1136   : > { %2567 = vmatpush3.bf16.msra.mxu1 %v2870_v32 }
0x1137   : > { %2568 = vmatprep.subr.bf16.mxu1 %v2871_v33 }
0x113a   : > { %2569 = vmatpush3.bf16.msra.mxu1 %v2872_v34 }
0x11dd   : > { %v1823_v45 = vpop.f32.mrf.mxu1 }
0x11de   : > { %v1829_v46 = vadd.f32 %v1823_v45, %v1671_v28 }
0x11df   : > { %v2723_v47 = vpop.f32.mrf.mxu1 }
0x11e0   : > { %v1830_v48 = vadd.f32 %v1829_v46, %v3217_v13  ;;  %v2847_v13 = vld [vmem:[%s3215_s17 + $0x34] ss:$8 sps:$4 sm:$0xff]  }
0x11e1   : > { %v1826_v49 = vpop.f32.mrf.mxu1  ;;  %1935 = vmatprep.subr.bf16.mxu0 %v2847_v13 }
0x11e2   : > { %v1835_v50 = vadd.f32 %v1834_v4, %v1830_v48  ;;  %1936 = vmatpush1.bf16.msra.mxu0 %v2845_v58  ;;  %v2010_v48 = vrot.slane %v3438_v44, %v3236_v20  ;;  %v2163_v20 = vsub.s32 4, %v3225_v17 }
0x11e3   : > { %v2724_v51 = vpop.f32.mrf.mxu1  ;;  %1937 = vmatprep.subr.bf16.mxu0 %v2850_v59 }
0x11e4   : > { %v1836_v52 = vsel %vm521_vm1, %v1835_v50, 0.0 }
0x11e5   : > { %1837 = vadd.xlane.f32.xlu1 %v1836_v52 }
0x11e6   : > { %1938 = vmatpush1.bf16.msra.mxu0 %v2848_v60 }
0x11e7   : > { %1939 = vmatprep.subr.bf16.mxu0 %v2853_v61 }
0x11ea   : > { %1940 = vmatpush1.bf16.msra.mxu0 %v2851_v62  ;;  %v2168_v62 = vsub.s32 5, %v3225_v17 }
0x11eb   : > { %1941 = vmatprep.subr.bf16.mxu0 %v2856_v63  ;;  %v2164_v63 = vrot.slane %v3438_v44, %v2163_v20 }
0x11ec   : > { %v2169_v1 = vrot.slane %v3438_v44, %v2168_v62 }
0x11ee   : > { %1942 = vmatpush1.bf16.msra.mxu0 %v2854_v0 }
0x126e   : > { %v1838_v53 = vpop.xlane.xlu1 %1837 }
0x126f   : > { %v1840_v54 = vmul.f32 0.015625, %v1838_v53 }
0x1271   : > { %v1841_v55 = vsub.f32 %v1835_v50, %v1840_v54 }
0x1273   : > { %v1842_v56 = vmul.f32 %v1841_v55, %v1841_v55 }
0x1275   : > { %v1843_v57 = vsel %vm521_vm1, %v1842_v56, 0.0 }
0x1276   : > { %1844 = vadd.xlane.f32.xlu1 %v1843_v57 }
0x12ff   : > { %v1845_v14 = vpop.xlane.xlu1 %1844 }
0x1300   : > { %v1846_v16 = vmul.f32 0.015625, %v1845_v14 }
0x1302   : > { %v1847_v19 = vadd.f32 1e-05, %v1846_v16 }
0x1304   : > { %2905 = vrsqrt.f32 %v1847_v19 }
0x1311   : > { %v2906_v24 = vpop.eup %2905 }
0x1312   : > { %v1849_v25 = vmul.f32 %v2906_v24, %v1841_v55 }
0x1314   : > { %v1854_v27 = vmul.f32 %v1853_v23, %v1849_v25 }
0x1316   : > { %v1859_v28 = vadd.f32 %v1858_v15, %v1854_v27 }
0x1318   : > { %v1860_v30 = vpack.c.bf16 %v1859_v28, %v1859_v28 }
0x131a   : > { %2472 = vmatmul.mubr.msk.bf16.vlgmr.msra.gmra.mxu0 %vm521_vm1, %v1860_v30 }
0x13da   : > { %v1961_v38 = vpop.f32.mrf.mxu0 }
0x13db   : > { %v1962_v39 = vadd.f32 %v1961_v38, %v1877_v36 }
0x13dc   : > { %v1963_v29 = vpop.f32.mrf.mxu0 }
0x13dd   : > { %v1964_v40 = vadd.f32 %v1963_v29, %v1881_v37  ;;  %v1968_v41 = vmax.f32 %v1962_v39, 0.0 }
0x13de   : > { %v1965_v42 = vpop.f32.mrf.mxu0 }
0x13df   : > { %v1969_v43 = vmax.f32 %v1964_v40, 0.0  ;;  %v1970_v4 = vpack.c.bf16 %v1968_v41, %v1968_v41 }
0x13e0   : > { %v1966_v45 = vpop.f32.mrf.mxu0 }
0x13e1   : > { %v1971_v46 = vpack.c.bf16 %v1969_v43, %v1969_v43 }
0x13e3   : > { %2139 = vmatprep.mubr.bf16.mxu1 %v1971_v46 }
0x13e4   : > { %2140 = vmatmul.mubr.bf16.vlgmr.msra.gmra.mxu1 %v1970_v4 }
0x14a4   : > { %v2570_v47 = vpop.f32.mrf.mxu1 }
0x14a6   : > { %v2571_v49 = vpop.f32.mrf.mxu1 }
0x14a7   : > { %v2572_v18 = vadd.f32 %v2571_v49, %v2570_v47 }
0x14a8   : > { %v2573_v50 = vpop.f32.mrf.mxu1 }
0x14a9   : > { %v2142_v51 = vadd.f32 %v2572_v18, %v2010_v48 }
0x14aa   : > { %v2574_v52 = vpop.f32.mrf.mxu1 }
0x14ab   : > { %v2147_v53 = vadd.f32 %v2142_v51, %v1859_v28 }
0x14ad   : > { %v2148_v54 = vsel %vm521_vm1, %v2147_v53, 0.0 }
0x14ae   : > { %2149 = vadd.xlane.f32.xlu1 %v2148_v54 }
0x1537   : > { %v2150_v55 = vpop.xlane.xlu1 %2149 }
0x1538   : > { %v2151_v56 = vmul.f32 0.015625, %v2150_v55 }
0x153a   : > { %v2152_v57 = vsub.f32 %v2147_v53, %v2151_v56 }
0x153c   : > { %v2153_v13 = vmul.f32 %v2152_v57, %v2152_v57 }
0x153e   : > { %v2154_v58 = vsel %vm521_vm1, %v2153_v13, 0.0 }
0x153f   : > { %2155 = vadd.xlane.f32.xlu1 %v2154_v58 }
0x15c8   : > { %v2156_v59 = vpop.xlane.xlu1 %2155 }
0x15c9   : > { %v2157_v60 = vmul.f32 0.015625, %v2156_v59 }
0x15cb   : > { %v2158_v61 = vadd.f32 1e-05, %v2157_v60 }
0x15cd   : > { %2907 = vrsqrt.f32 %v2158_v61 }
0x15da   : > { %v2908_v0 = vpop.eup %2907 }
0x15db   : > { %v2160_v2 = vmul.f32 %v2908_v0, %v2152_v57 }
0x15dd   : > { %v2165_v26 = vmul.f32 %v2164_v63, %v2160_v2  ;;  %2175 = sbr.rel (%p2491_p0) target bundleno = 5841 (0x16d1), region = 72 }
0x15df   : > { %v2170_v3 = vadd.f32 %v2169_v1, %v2165_v26 }
0x15e1   : > { %2171 = vst.msk [vmem:[#allocation2] sm:$0xff] %vm521_vm1, %v2170_v3 }
0x15e2   : > { %v2909_v5 = vld [vmem:[%s3596_s9 + $0x18] sm:$0xff]   ;;  %v3055_v6 = vmov 0.0   ;;  %v2910_v7 = vld [vmem:[%s3596_s9 + $0x10] sm:$0xff]   ;;  %vm3056_vm5 = vmmov 0   ;;  %v2911_v44 = vld [vmem:[%s3596_s9 + $0x8] sm:$0xff]   ;;  %v2176_v9 = vpack.c.bf16 %v2170_v3, %v2170_v3 }
0x15e3   : > { %2725 = vmatprep.subr.bf16.mxu0 %v3055_v6  ;;  %2733 = vmatprep.mubr.msk.bf16.mxu0 %vm3056_vm5, %v3055_v6  ;;  %v2912_v8 = vld [vmem:[%s3596_s9] sm:$0xff]  }
0x15e4   : > { %2726 = vmatpush3.bf16.msra.mxu0 %v2909_v5  ;;  %v2492_v10 = vld [vmem:[%s3597_s10] ss:$0 sm:$0xff] }
0x15e5   : > { %2727 = vmatprep.subr.bf16.mxu0 %v3055_v6 }
0x15e8   : > { %2728 = vmatpush3.bf16.msra.mxu0 %v2910_v7 }
0x15e9   : > { %2729 = vmatprep.subr.bf16.mxu0 %v3055_v6 }
0x15ec   : > { %2730 = vmatpush3.bf16.msra.mxu0 %v2911_v44 }
0x15ed   : > { %2731 = vmatprep.subr.bf16.mxu0 %v3055_v6 }
0x15f0   : > { %2732 = vmatpush3.bf16.msra.mxu0 %v2912_v8 }
0x15f3   : > { %2734 = vmatmul.mubr.msk.bf16.vlgmr.msra.gmra.mxu0 %vm521_vm1, %v2176_v9 }
0x16b3   : > { %v2253_v11 = vpop.f32.mrf.mxu0 }
0x16b4   : > { %v2254_v12 = vadd.f32 %v2492_v10, %v2253_v11 }
0x16b5   : > { %v2735_v14 = vpop.f32.mrf.mxu0 }
0x16b6   : > { %v2259_v16 = vrot.slane %v2254_v12, 4 }
0x16b7   : > { %v2256_v19 = vpop.f32.mrf.mxu0 }
0x16b8   : > { %v2260_v21 = vmax.f32 %v2254_v12, %v2259_v16 }
0x16b9   : > { %v2736_v22 = vpop.f32.mrf.mxu0 }
0x16ba   : > { %v2261_v23 = vrot.slane %v2260_v21, 2 }
0x16bc   : > { %v2262_v24 = vmax.f32 %v2260_v21, %v2261_v23 }
0x16be   : > { %v2263_v25 = vrot.slane %v2262_v24, 1 }
0x16c0   : > { %v2264_v15 = vmax.f32 %v2262_v24, %v2263_v25 }
0x16c2   : > { %vm2267_vm6 = vcmp.eq.f32.partialorder %v2254_v12, %v2264_v15  ;;  %2278 = vst [vmem:[%s419_s14] sm:$0x1] %v2264_v15 }
0x16c3   : > { %v2268_v27 = vsel %vm2267_vm6, %v3225_v17, 8 }
0x16c4   : > { %v2269_v28 = vrot.slane %v2268_v27, 4 }
0x16c6   : > { %vm2270_vm7 = vcmp.lt.s32.totalorder %v2268_v27, %v2269_v28 }
0x16c7   : > { %v2271_v30 = vsel %vm2270_vm7, %v2268_v27, %v2269_v28 }
0x16c8   : > { %v2272_v31 = vrot.slane %v2271_v30, 2 }
0x16ca   : > { %vm2273_vm8 = vcmp.lt.s32.totalorder %v2271_v30, %v2272_v31 }
0x16cb   : > { %v2274_v32 = vsel %vm2273_vm8, %v2271_v30, %v2272_v31 }
0x16cc   : > { %v2275_v33 = vrot.slane %v2274_v32, 1 }
0x16ce   : > { %vm2276_vm9 = vcmp.lt.s32.totalorder %v2274_v32, %v2275_v33 }
0x16cf   : > { %v2277_v34 = vsel %vm2276_vm9, %v2274_v32, %v2275_v33 }
0x16d0   : > { %2279 = vst [vmem:[%s3604_s27] sm:$0x1] %v2277_v34 }
0x16d1 PF: > { %s3605_s13 = sshll.u32 %s3023_s25, 4  ;;  %s2297_s17 = sshll.u32 %s419_s14, 4  ;;  %s2298_s17 = int_to_ptr.vmem [resolvable:$true] %s2297_s17 }
0x16d2   : > { %s2295_s18 = scalar_lea.hbm %s3598_s11, %s3605_s13  ;;  %s2281_s24 = scalar_lea.sflag [#allocation4], %s3194_s20 }
0x16d3   : > { %s2913_s26 = scalar_lea.vmem %s2298_s17, 16  ;;  %s3057_s29 = smov [#allocation3]  }
0x16d4   : > { %p2914_p1 = scmp.ne.s32.totalorder %s2298_s17, %s2913_s26  ;;  %s2917_s19 = sshll.u32 %s3057_s29, 4  ;;  %s2918_s19 = int_to_ptr.vmem [resolvable:$false] %s2917_s19 }
0x16d5   : > { %s2919_s27 = scalar_lea.vmem %s2918_s19, 32  ;;  %p2920_p5 = scmp.lt.s32.totalorder %s2298_s17, %s2918_s19 }
0x16d6   : > { %p2915_p2 = pnand %p2914_p1, %p3173_p3  ;;  %p2921_p6 = scmp.lt.s32.totalorder %s2919_s27, %s2913_s26 }
0x16d8   : > { %p2916_p4 = pneg %p2915_p2  ;;  %p2922_p7 = por %p2921_p6, %p2920_p5 }
0x16da   : > { %p2923_p8 = pnand %p2922_p7, %p2916_p4 }
0x16dc   : > { %2926 = shalt.err (!%p2923_p8)
}
0x16dd   : > { %s2927_s16 = scalar_lea.hbm %s2295_s18, 16  ;;  %s2931_s13 = scalar_lea.hbm %s3598_s11, 32 }
0x16de   : > { %p2928_p10 = scmp.ne.s32.totalorder %s2295_s18, %s2927_s16  ;;  %p2932_p13 = scmp.lt.s32.totalorder %s2295_s18, %s3598_s11 }
0x16df   : > { %p2933_p0 = scmp.lt.s32.totalorder %s2931_s13, %s2927_s16 }
0x16e0   : > { %p2929_p11 = pnand %p2928_p10, %p3173_p3 }
0x16e1   : > { %p2934_p1 = por %p2933_p0, %p2932_p13 }
0x16e2   : > { %p2930_p12 = pneg %p2929_p11 }
0x16e4   : > { %p2935_p2 = pnand %p2934_p1, %p2930_p12 }
0x16e6   : > { %2938 = shalt.err (!%p2935_p2)
}
0x16e7   : > { %2737 = dma.vmem_to_hbm [thread:$0]  (%p3173_p3), %s2298_s17, 16, %s2295_s18, %s2281_s24  }
0x16e8   : > { %s3620_s27 = sshll.u32 %s3023_s25, 4  ;;  %s3621_s14 = scalar_lea.vmem [#allocation5], %s3194_s20 }
0x16e9   : > { %s2308_s19 = scalar_lea.hbm %s3599_s12, %s3620_s27  ;;  %s2310_s30 = sshll.u32 %s3621_s14, 4  ;;  %s2311_s30 = int_to_ptr.vmem [resolvable:$true] %s2310_s30 }
0x16ea   : > { %s2285_s0 = scalar_lea.sflag [#allocation6], %s3194_s20  ;;  %s2939_s1 = scalar_lea.vmem %s2311_s30, 16 }
0x16eb   : > { %p2940_p4 = scmp.ne.s32.totalorder %s2311_s30, %s2939_s1  ;;  %s3058_s13 = smov [#allocation5]  }
0x16ec   : > { %s2943_s16 = sshll.u32 %s3058_s13, 4  ;;  %s2944_s16 = int_to_ptr.vmem [resolvable:$false] %s2943_s16 }
0x16ed   : > { %p2941_p5 = pnand %p2940_p4, %p3173_p3  ;;  %s2945_s2 = scalar_lea.vmem %s2944_s16, 32 }
0x16ee   : > { %p2946_p7 = scmp.lt.s32.totalorder %s2311_s30, %s2944_s16  ;;  %p2947_p8 = scmp.lt.s32.totalorder %s2945_s2, %s2939_s1 }
0x16ef   : > { %p2942_p6 = pneg %p2941_p5 }
0x16f0   : > { %p2948_p10 = por %p2947_p8, %p2946_p7 }
0x16f2   : > { %p2949_p11 = pnand %p2948_p10, %p2942_p6 }
0x16f4   : > { %2952 = shalt.err (!%p2949_p11)
}
0x16f5   : > { %s2953_s25 = scalar_lea.hbm %s2308_s19, 16  ;;  %s2957_s17 = scalar_lea.hbm %s3599_s12, 32 }
0x16f6   : > { %p2954_p12 = scmp.ne.s32.totalorder %s2308_s19, %s2953_s25  ;;  %p2958_p1 = scmp.lt.s32.totalorder %s2308_s19, %s3599_s12 }
0x16f7   : > { %p2959_p2 = scmp.lt.s32.totalorder %s2957_s17, %s2953_s25 }
0x16f8   : > { %p2955_p13 = pnand %p2954_p12, %p3173_p3 }
0x16f9   : > { %p2960_p4 = por %p2959_p2, %p2958_p1 }
0x16fa   : > { %p2956_p0 = pneg %p2955_p13 }
0x16fc   : > { %p2961_p5 = pnand %p2960_p4, %p2956_p0 }
0x16fe   : > { %2964 = shalt.err (!%p2961_p5)
}
0x16ff   : > { %2738 = dma.vmem_to_hbm [thread:$0]  (%p3173_p3), %s2311_s30, 16, %s2308_s19, %s2285_s0  }
0x1700 PF: > { %p2748_p6 = scmp.ge.s32.totalorder %s3035_s28, 2  ;;  %s2322_s26 = sand.u32 1, %s3007_s21  }
0x1701   : > { %s2323_s29 = scalar_lea.sflag [#allocation4], %s2322_s26 }
0x1702   : > { %p2742_p7 = pnand %p2748_p6, %p3183_p9 }
0x1704   : > { %p2743_p8 = pneg %p2742_p7 }
0x1706   : > { %2998 = dma.done.wait (%p2743_p8), %s2323_s29, 16  }
0x1707   : > { %3000 = vsyncadd (%p2743_p8), %s2323_s29, 4294967280  ;;  %s2331_s14 = scalar_lea.sflag [#allocation6], %s2322_s26 }
0x1708   : > { %3002 = dma.done.wait (%p2743_p8), %s2331_s14, 16  }
0x1709   : > { %3004 = vsyncadd (%p2743_p8), %s2331_s14, 4294967280  ;;  %s29_s28 = sadd.s32 1, %s3035_s28   ;;  %s3623_s15 = sld [smem:[#allocation14_spill]] }
0x170a   : > { %p26_p10 = scmp.ge.s32.totalorder %s29_s28, 6   ;;  %s3624_s24 = sld [smem:[#allocation9_spill]] }
0x170b   : > { %s3625_s25 = sld [smem:[#allocation10_spill]]  ;;  %s3628_s21 = smov %s3011_s22 }
0x170c   : > { %s3626_s26 = sld [smem:[#allocation11_spill]]  ;;  %s3629_s22 = smov %s3015_s23 }
0x170d   : > { %s3627_s27 = sld [smem:[#allocation12_spill]]  ;;  %28 = sbr.rel (!%p26_p10) target bundleno = 11 (0xb), region = 131 }
0x170f   : > { %s3630_s23 = smov %s3623_s15 }
0x1712   :  { %2335 = vsyncpa [#allocation4], 1 }
0x1713   :  { %2337 = vsyncpa [#allocation4 + $0x1], 1 }
0x1714   :  { %2338 = vsyncpa [#allocation6], 1 }
0x1715   :  { %2340 = vsyncpa [#allocation6 + $0x1], 1 }

</bundles_post_ra>
